<compile_context>
chip_gen: v6e
topology: v6e:2x2x1
jax: 0.10.0
libtpu: 0.0.40
codegen_flags: <defaults>
</compile_context>

<pallas_src>
import functools

import jax
import jax.numpy as jnp
import numpy as np
from jax.experimental import pallas as pl
from jax.experimental.pallas import tpu as pltpu


_R0 = 8  # sublane-aligned first interior row of the haloed column scratch


def _spatial_attention_kernel(x_ref, w_ref, o_ref, col_ref, *, C, H, W, K, B):
    """Fused CBAM spatial attention for one batch tile.

    x_ref:   (B, C, H, W) input tile (native dtype).
    w_ref:   (2*K*K,) f32 conv weights in SMEM (index = c*K*K + kh*K + kw).
    o_ref:   (1, H, B*W) lane-dense output tile (batch packed along lanes).
    col_ref: (R0 + H + 8, B*W) f32 VMEM scratch; rows [R0, R0+H) hold the
             current W-shifted slab, rows [0, R0) and [R0+H, R0+H+8) are the
             zero H-halo for the conv taps.
    """
    P = K // 2
    BW = B * W
    f32 = jnp.float32

    # ---- single-pass channel reduction (sum + max), no full f32 copy -------
    x0 = x_ref[:, 0].astype(f32)                    # (B, H, W)
    s = x0
    m = x0
    for c in range(1, C):
        xc = x_ref[:, c].astype(f32)
        s = s + xc
        m = jnp.maximum(m, xc)
    avg = s * (1.0 / C)

    # ---- pack the two reduced planes lane-dense: (B, H, W) -> (H, B*W) -----
    def pack(plane):
        if B == 1:
            return plane[0]
        return jnp.concatenate([plane[b] for b in range(B)], axis=-1)

    planes = (pack(avg), pack(m))                   # (avg, max), each (H, BW)

    # ---- hoisted lane masks for the W-direction shifts (6 masks total) -----
    lane = jax.lax.broadcasted_iota(jnp.int32, (H, BW), 1)
    wpos = lane % W                                 # column index within a batch segment
    masks = {}
    for dw in range(-P, P + 1):
        if dw > 0:
            masks[dw] = wpos < (W - dw)
        elif dw < 0:
            masks[dw] = wpos >= (-dw)

    # ---- zero only the halo rows (interior rows are overwritten below) -----
    zero_halo = jnp.zeros((8, BW), f32)             # _R0 == 8
    col_ref[0:_R0, :] = zero_halo
    col_ref[_R0 + H:_R0 + H + 8, :] = zero_halo

    # ---- 7x7 conv: ONE lane shift per (channel, kw); the 7 kh taps are pure
    #      sublane-offset loads against the zero halo ------------------------
    acc = jnp.zeros((H, BW), f32)
    for c in range(2):                              # channel 0 = avg, 1 = max
        pk = planes[c]
        for kw in range(K):
            dw = kw - P
            if dw == 0:
                shifted = pk
            else:
                # roll whole packed lane axis by dw, then zero the lanes that
                # crossed a batch-segment boundary (or wrapped around).
                shifted = jnp.where(masks[dw], jnp.roll(pk, -dw, axis=1), 0.0)
            col_ref[_R0:_R0 + H, :] = shifted       # 8-row-aligned store
            for kh in range(K):
                wv = w_ref[c * K * K + kh * K + kw]  # scalar tap from SMEM
                r = _R0 - P + kh
                acc = acc + wv * col_ref[r:r + H, :]

    o_ref[0, :, :] = jax.nn.sigmoid(acc).astype(o_ref.dtype)


def _ceil_to(a, m):
    return (a + m - 1) // m * m


def _tpu_vmem_and_cores():
    """Physical per-core VMEM bytes and TensorCores-per-chip (best effort)."""
    vmem = 64 << 20                                  # conservative (v7x) default
    cores = 1
    try:
        vmem = int(pltpu.get_tpu_info().vmem_capacity_bytes)
    except Exception:
        pass
    try:
        kind = jax.devices()[0].device_kind.lower()
        if "v7" in kind:
            cores = 2                                # two TCs share a "parallel" grid
    except Exception:
        pass
    return vmem, cores


def _pick_batch_tile(N, C, H, W, itemsize, budget_bytes, num_cores, max_b=256):
    """Largest batch tile whose estimated VMEM footprint (double-buffered
    input/output blocks + scratch + f32 temporaries) fits the budget."""
    subl = _ceil_to(H, 8)
    lanes_in = _ceil_to(W, 128)
    itemsize = max(int(itemsize), 1)

    def footprint(b):
        bw = _ceil_to(b * W, 128)
        in_block = b * C * subl * lanes_in * itemsize
        out_block = subl * bw * itemsize
        scratch = _ceil_to(_R0 + H + 8, 8) * bw * 4
        temps_unpacked = 4 * b * subl * lanes_in * 4   # per-c slab, sum, max, avg
        temps_packed = 6 * subl * bw * 4               # packed planes, shifted, acc, masks
        return 2 * in_block + 2 * out_block + scratch + temps_unpacked + temps_packed

    cap = min(N, max_b)
    if num_cores > 1 and N >= num_cores:
        cap = min(cap, pl.cdiv(N, num_cores))        # keep >= num_cores grid steps (v7x)
    cap = max(cap, 1)

    best = 1
    for b in range(1, cap + 1):
        if footprint(b) <= budget_bytes:
            best = b
    # Mild preference for a 128-lane-dense tile (unmasked stores), but never
    # shrink the tile by more than 2x for it.
    if (best * W) % 128 != 0:
        for b in range(best, 0, -1):
            if (b * W) % 128 == 0 and 2 * b >= best:
                best = b
                break
    return best


def spatial_attention(x, weight, kernel_size=7):
    """x: (N, C, H, W); weight: (1, 2, K, K), no bias. Returns (N, 1, H, W)."""
    N, C, H, W = x.shape
    K = kernel_size
    assert weight.shape == (1, 2, K, K)

    vmem_phys, num_cores = _tpu_vmem_and_cores()
    # ~48 MiB on v7x (64 MiB physical), ~96 MiB on v5e/v6e (128 MiB physical).
    vmem_limit = int(min(vmem_phys * 3 // 4, 110 << 20))
    tile_budget = int(vmem_limit * 0.7)

    B = _pick_batch_tile(N, C, H, W, x.dtype.itemsize, tile_budget, num_cores)
    G = pl.cdiv(N, B)
    Np = G * B
    if Np != N:                                      # pad awkward N instead of B=1
        x = jnp.pad(x, ((0, Np - N), (0, 0), (0, 0), (0, 0)))

    w_flat = weight.reshape(-1).astype(jnp.float32)  # (2*K*K,) scalars in SMEM

    kernel = functools.partial(_spatial_attention_kernel,
                               C=C, H=H, W=W, K=K, B=B)
    out = pl.pallas_call(
        kernel,
        out_shape=jax.ShapeDtypeStruct((G, H, B * W), x.dtype),
        grid=(G,),
        in_specs=[
            pl.BlockSpec((B, C, H, W), lambda n: (n, 0, 0, 0)),
            pl.BlockSpec(memory_space=pltpu.MemorySpace.SMEM),
        ],
        out_specs=pl.BlockSpec((1, H, B * W), lambda n: (n, 0, 0)),
        scratch_shapes=[pltpu.VMEM((_R0 + H + 8, B * W), jnp.float32)],
        compiler_params=pltpu.CompilerParams(
            dimension_semantics=("parallel",),       # batch blocks independent
            vmem_limit_bytes=vmem_limit),
    )(x, w_flat)

    # Lane-dense (G, H, B*W) -> (N, 1, H, W): cheap XLA relayout of the small
    # single-channel output (1/C of the input traffic).
    out = out.reshape(G, H, B, W).transpose(0, 2, 1, 3).reshape(Np, 1, H, W)
    return out[:N]


def reference(x, weight):
    """Pure-JAX reference matching the PyTorch forward."""
    avg = jnp.mean(x, axis=1, keepdims=True)
    mx = jnp.max(x, axis=1, keepdims=True)
    feat = jnp.concatenate([avg, mx], axis=1)
    out = jax.lax.conv_general_dilated(
        feat, weight, window_strides=(1, 1), padding="SAME",
        dimension_numbers=("NCHW", "OIHW", "NCHW"))
    return jax.nn.sigmoid(out)


if __name__ == "__main__":
    key = jax.random.PRNGKey(0)
    kx, kw = jax.random.split(key)

    N, C, H, W = 2, 4, 16, 16
    K = 7
    x = jax.random.normal(kx, (N, C, H, W), dtype=jnp.float32)

    # Deterministic conv weight, kaiming-uniform-like scale (fan_in = 2*K*K).
    fan_in = 2 * K * K
    bound = 1.0 / np.sqrt(fan_in)
    weight = jax.random.uniform(kw, (1, 2, K, K), dtype=jnp.float32,
                                minval=-bound, maxval=bound)

    out = spatial_attention(x, weight, kernel_size=K)
    out = jax.block_until_ready(out)

    ref = reference(x, weight)
    assert out.shape == (N, 1, H, W)
    np.testing.assert_allclose(np.asarray(out), np.asarray(ref),
                               atol=1e-5, rtol=1e-5)
    print("KERNEL_OK")
</pallas_src>

<mosaic_0001>
module attributes {stable_mosaic.version = 11 : i64} {
  func.func @_spatial_attention_kernel(%arg0: i32, %arg1: memref<2x4x16x16xf32, #tpu.memory_space<vmem>>, %arg2: memref<98xf32, #tpu.memory_space<smem>>, %arg3: memref<1x16x32xf32, #tpu.memory_space<vmem>>, %arg4: memref<32x32xf32, #tpu.memory_space<vmem>>) attributes {dimension_semantics = [#tpu.dimension_semantics<parallel>], iteration_bounds = array<i64: 1>, scalar_prefetch = 0 : i64, scratch_operands = 1 : i64, tpu.core_type = #tpu.core_type<tc>, window_params = [{transform_indices = @transform_0, window_bounds = array<i64: 2, 4, 16, 16>}, {transform_indices = @transform_1, window_bounds = array<i64: 98>}, {transform_indices = @transform_2, window_bounds = array<i64: 1, 16, 32>}]} {
    %c0 = arith.constant 0 : index
    %c0_0 = arith.constant 0 : index
    %c0_1 = arith.constant 0 : index
    %c0_2 = arith.constant 0 : index
    %0 = vector.load %arg1[%c0, %c0_0, %c0_1, %c0_2] : memref<2x4x16x16xf32, #tpu.memory_space<vmem>>, vector<2x1x16x16xf32>
    %1 = vector.shape_cast %0 : vector<2x1x16x16xf32> to vector<2x16x16xf32>
    %c0_3 = arith.constant 0 : index
    %c1 = arith.constant 1 : index
    %c0_4 = arith.constant 0 : index
    %c0_5 = arith.constant 0 : index
    %2 = vector.load %arg1[%c0_3, %c1, %c0_4, %c0_5] : memref<2x4x16x16xf32, #tpu.memory_space<vmem>>, vector<2x1x16x16xf32>
    %3 = vector.shape_cast %2 : vector<2x1x16x16xf32> to vector<2x16x16xf32>
    %4 = arith.addf %1, %3 : vector<2x16x16xf32>
    %5 = arith.maximumf %1, %3 : vector<2x16x16xf32>
    %c0_6 = arith.constant 0 : index
    %c2 = arith.constant 2 : index
    %c0_7 = arith.constant 0 : index
    %c0_8 = arith.constant 0 : index
    %6 = vector.load %arg1[%c0_6, %c2, %c0_7, %c0_8] : memref<2x4x16x16xf32, #tpu.memory_space<vmem>>, vector<2x1x16x16xf32>
    %7 = vector.shape_cast %6 : vector<2x1x16x16xf32> to vector<2x16x16xf32>
    %8 = arith.addf %4, %7 : vector<2x16x16xf32>
    %9 = arith.maximumf %5, %7 : vector<2x16x16xf32>
    %c0_9 = arith.constant 0 : index
    %c3 = arith.constant 3 : index
    %c0_10 = arith.constant 0 : index
    %c0_11 = arith.constant 0 : index
    %10 = vector.load %arg1[%c0_9, %c3, %c0_10, %c0_11] : memref<2x4x16x16xf32, #tpu.memory_space<vmem>>, vector<2x1x16x16xf32>
    %11 = vector.shape_cast %10 : vector<2x1x16x16xf32> to vector<2x16x16xf32>
    %12 = arith.addf %8, %11 : vector<2x16x16xf32>
    %13 = arith.maximumf %9, %11 : vector<2x16x16xf32>
    %cst = arith.constant 2.500000e-01 : f32
    %14 = vector.broadcast %cst : f32 to vector<2x16x16xf32>
    %15 = arith.mulf %12, %14 : vector<2x16x16xf32>
    %16 = vector.extract_strided_slice %15 {offsets = [0, 0, 0], sizes = [1, 16, 16], strides = [1, 1, 1]} : vector<2x16x16xf32> to vector<1x16x16xf32>
    %17 = vector.shape_cast %16 : vector<1x16x16xf32> to vector<16x16xf32>
    %18 = vector.extract_strided_slice %15 {offsets = [1, 0, 0], sizes = [1, 16, 16], strides = [1, 1, 1]} : vector<2x16x16xf32> to vector<1x16x16xf32>
    %19 = vector.shape_cast %18 : vector<1x16x16xf32> to vector<16x16xf32>
    %20 = tpu.concatenate %17, %19 in 1 : vector<16x16xf32>, vector<16x16xf32> -> vector<16x32xf32>
    %21 = vector.extract_strided_slice %13 {offsets = [0, 0, 0], sizes = [1, 16, 16], strides = [1, 1, 1]} : vector<2x16x16xf32> to vector<1x16x16xf32>
    %22 = vector.shape_cast %21 : vector<1x16x16xf32> to vector<16x16xf32>
    %23 = vector.extract_strided_slice %13 {offsets = [1, 0, 0], sizes = [1, 16, 16], strides = [1, 1, 1]} : vector<2x16x16xf32> to vector<1x16x16xf32>
    %24 = vector.shape_cast %23 : vector<1x16x16xf32> to vector<16x16xf32>
    %25 = tpu.concatenate %22, %24 in 1 : vector<16x16xf32>, vector<16x16xf32> -> vector<16x32xf32>
    %26 = tpu.iota {dimensions = array<i32: 1>} : vector<16x32xi32>
    %c16_i32 = arith.constant 16 : i32
    %c0_i32 = arith.constant 0 : i32
    %27 = arith.cmpi eq, %c16_i32, %c0_i32 : i32
    %c1_i32 = arith.constant 1 : i32
    %28 = arith.select %27, %c1_i32, %c16_i32 : i32
    %29 = vector.broadcast %28 : i32 to vector<16x32xi32>
    %30 = arith.remsi %26, %29 : vector<16x32xi32>
    %c0_i32_12 = arith.constant 0 : i32
    %31 = vector.broadcast %c0_i32_12 : i32 to vector<16x32xi32>
    %32 = arith.cmpi ne, %30, %31 : vector<16x32xi32>
    %c0_i32_13 = arith.constant 0 : i32
    %33 = vector.broadcast %c0_i32_13 : i32 to vector<16x32xi32>
    %34 = arith.cmpi slt, %30, %33 : vector<16x32xi32>
    %c0_i32_14 = arith.constant 0 : i32
    %35 = arith.cmpi slt, %28, %c0_i32_14 : i32
    %36 = vector.broadcast %35 : i1 to vector<16x32xi1>
    %37 = vector.broadcast %36 : vector<16x32xi1> to vector<16x32xi1>
    %38 = arith.xori %34, %37 : vector<16x32xi1>
    %39 = arith.andi %38, %32 : vector<16x32xi1>
    %40 = vector.broadcast %28 : i32 to vector<16x32xi32>
    %41 = arith.addi %30, %40 : vector<16x32xi32>
    %42 = arith.select %39, %41, %30 : vector<16x32xi1>, vector<16x32xi32>
    %c3_i32 = arith.constant 3 : i32
    %43 = vector.broadcast %c3_i32 : i32 to vector<16x32xi32>
    %44 = arith.cmpi sge, %42, %43 : vector<16x32xi32>
    %c2_i32 = arith.constant 2 : i32
    %45 = vector.broadcast %c2_i32 : i32 to vector<16x32xi32>
    %46 = arith.cmpi sge, %42, %45 : vector<16x32xi32>
    %c1_i32_15 = arith.constant 1 : i32
    %47 = vector.broadcast %c1_i32_15 : i32 to vector<16x32xi32>
    %48 = arith.cmpi sge, %42, %47 : vector<16x32xi32>
    %c15_i32 = arith.constant 15 : i32
    %49 = vector.broadcast %c15_i32 : i32 to vector<16x32xi32>
    %50 = arith.cmpi slt, %42, %49 : vector<16x32xi32>
    %c14_i32 = arith.constant 14 : i32
    %51 = vector.broadcast %c14_i32 : i32 to vector<16x32xi32>
    %52 = arith.cmpi slt, %42, %51 : vector<16x32xi32>
    %c13_i32 = arith.constant 13 : i32
    %53 = vector.broadcast %c13_i32 : i32 to vector<16x32xi32>
    %54 = arith.cmpi slt, %42, %53 : vector<16x32xi32>
    %cst_16 = arith.constant 0.000000e+00 : f32
    %55 = vector.broadcast %cst_16 : f32 to vector<8x32xf32>
    %c0_17 = arith.constant 0 : index
    %c0_18 = arith.constant 0 : index
    %56 = vector.load %arg4[%c0_17, %c0_18] : memref<32x32xf32, #tpu.memory_space<vmem>>, vector<8x32xf32>
    tpu.vector_store %arg4[%c0_17, %c0_18], %55 {strides = array<i32>} : memref<32x32xf32, #tpu.memory_space<vmem>>, vector<8x32xf32>,
    %c24 = arith.constant 24 : index
    %c0_19 = arith.constant 0 : index
    %57 = vector.load %arg4[%c24, %c0_19] : memref<32x32xf32, #tpu.memory_space<vmem>>, vector<8x32xf32>
    tpu.vector_store %arg4[%c24, %c0_19], %55 {strides = array<i32>} : memref<32x32xf32, #tpu.memory_space<vmem>>, vector<8x32xf32>,
    %cst_20 = arith.constant 0.000000e+00 : f32
    %58 = vector.broadcast %cst_20 : f32 to vector<16x32xf32>
    %59 = vector.extract_strided_slice %20 {offsets = [0, 29], sizes = [16, 3], strides = [1, 1]} : vector<16x32xf32> to vector<16x3xf32>
    %60 = vector.extract_strided_slice %20 {offsets = [0, 0], sizes = [16, 29], strides = [1, 1]} : vector<16x32xf32> to vector<16x29xf32>
    %61 = tpu.concatenate %59, %60 in 1 : vector<16x3xf32>, vector<16x29xf32> -> vector<16x32xf32>
    %cst_21 = arith.constant 0.000000e+00 : f32
    %62 = vector.broadcast %cst_21 : f32 to vector<16x32xf32>
    %63 = arith.select %44, %61, %62 : vector<16x32xi1>, vector<16x32xf32>
    %c8 = arith.constant 8 : index
    %c0_22 = arith.constant 0 : index
    %64 = vector.load %arg4[%c8, %c0_22] : memref<32x32xf32, #tpu.memory_space<vmem>>, vector<16x32xf32>
    tpu.vector_store %arg4[%c8, %c0_22], %63 {strides = array<i32>} : memref<32x32xf32, #tpu.memory_space<vmem>>, vector<16x32xf32>,
    %c0_23 = arith.constant 0 : index
    %65 = memref.load %arg2[%c0_23] : memref<98xf32, #tpu.memory_space<smem>>
    %c5 = arith.constant 5 : index
    %c0_24 = arith.constant 0 : index
    %66 = vector.load %arg4[%c5, %c0_24] : memref<32x32xf32, #tpu.memory_space<vmem>>, vector<16x32xf32>
    %67 = vector.broadcast %65 : f32 to vector<16x32xf32>
    %68 = arith.mulf %67, %66 : vector<16x32xf32>
    %69 = arith.addf %58, %68 : vector<16x32xf32>
    %c7 = arith.constant 7 : index
    %70 = memref.load %arg2[%c7] : memref<98xf32, #tpu.memory_space<smem>>
    %c6 = arith.constant 6 : index
    %c0_25 = arith.constant 0 : index
    %71 = vector.load %arg4[%c6, %c0_25] : memref<32x32xf32, #tpu.memory_space<vmem>>, vector<16x32xf32>
    %72 = vector.broadcast %70 : f32 to vector<16x32xf32>
    %73 = arith.mulf %72, %71 : vector<16x32xf32>
    %74 = arith.addf %69, %73 : vector<16x32xf32>
    %c14 = arith.constant 14 : index
    %75 = memref.load %arg2[%c14] : memref<98xf32, #tpu.memory_space<smem>>
    %c7_26 = arith.constant 7 : index
    %c0_27 = arith.constant 0 : index
    %76 = vector.load %arg4[%c7_26, %c0_27] : memref<32x32xf32, #tpu.memory_space<vmem>>, vector<16x32xf32>
    %77 = vector.broadcast %75 : f32 to vector<16x32xf32>
    %78 = arith.mulf %77, %76 : vector<16x32xf32>
    %79 = arith.addf %74, %78 : vector<16x32xf32>
    %c21 = arith.constant 21 : index
    %80 = memref.load %arg2[%c21] : memref<98xf32, #tpu.memory_space<smem>>
    %c8_28 = arith.constant 8 : index
    %c0_29 = arith.constant 0 : index
    %81 = vector.load %arg4[%c8_28, %c0_29] : memref<32x32xf32, #tpu.memory_space<vmem>>, vector<16x32xf32>
    %82 = vector.broadcast %80 : f32 to vector<16x32xf32>
    %83 = arith.mulf %82, %81 : vector<16x32xf32>
    %84 = arith.addf %79, %83 : vector<16x32xf32>
    %c28 = arith.constant 28 : index
    %85 = memref.load %arg2[%c28] : memref<98xf32, #tpu.memory_space<smem>>
    %c9 = arith.constant 9 : index
    %c0_30 = arith.constant 0 : index
    %86 = vector.load %arg4[%c9, %c0_30] : memref<32x32xf32, #tpu.memory_space<vmem>>, vector<16x32xf32>
    %87 = vector.broadcast %85 : f32 to vector<16x32xf32>
    %88 = arith.mulf %87, %86 : vector<16x32xf32>
    %89 = arith.addf %84, %88 : vector<16x32xf32>
    %c35 = arith.constant 35 : index
    %90 = memref.load %arg2[%c35] : memref<98xf32, #tpu.memory_space<smem>>
    %c10 = arith.constant 10 : index
    %c0_31 = arith.constant 0 : index
    %91 = vector.load %arg4[%c10, %c0_31] : memref<32x32xf32, #tpu.memory_space<vmem>>, vector<16x32xf32>
    %92 = vector.broadcast %90 : f32 to vector<16x32xf32>
    %93 = arith.mulf %92, %91 : vector<16x32xf32>
    %94 = arith.addf %89, %93 : vector<16x32xf32>
    %c42 = arith.constant 42 : index
    %95 = memref.load %arg2[%c42] : memref<98xf32, #tpu.memory_space<smem>>
    %c11 = arith.constant 11 : index
    %c0_32 = arith.constant 0 : index
    %96 = vector.load %arg4[%c11, %c0_32] : memref<32x32xf32, #tpu.memory_space<vmem>>, vector<16x32xf32>
    %97 = vector.broadcast %95 : f32 to vector<16x32xf32>
    %98 = arith.mulf %97, %96 : vector<16x32xf32>
    %99 = arith.addf %94, %98 : vector<16x32xf32>
    %100 = vector.extract_strided_slice %20 {offsets = [0, 30], sizes = [16, 2], strides = [1, 1]} : vector<16x32xf32> to vector<16x2xf32>
    %101 = vector.extract_strided_slice %20 {offsets = [0, 0], sizes = [16, 30], strides = [1, 1]} : vector<16x32xf32> to vector<16x30xf32>
    %102 = tpu.concatenate %100, %101 in 1 : vector<16x2xf32>, vector<16x30xf32> -> vector<16x32xf32>
    %cst_33 = arith.constant 0.000000e+00 : f32
    %103 = vector.broadcast %cst_33 : f32 to vector<16x32xf32>
    %104 = arith.select %46, %102, %103 : vector<16x32xi1>, vector<16x32xf32>
    %c8_34 = arith.constant 8 : index
    %c0_35 = arith.constant 0 : index
    %105 = vector.load %arg4[%c8_34, %c0_35] : memref<32x32xf32, #tpu.memory_space<vmem>>, vector<16x32xf32>
    tpu.vector_store %arg4[%c8_34, %c0_35], %104 {strides = array<i32>} : memref<32x32xf32, #tpu.memory_space<vmem>>, vector<16x32xf32>,
    %c1_36 = arith.constant 1 : index
    %106 = memref.load %arg2[%c1_36] : memref<98xf32, #tpu.memory_space<smem>>
    %c5_37 = arith.constant 5 : index
    %c0_38 = arith.constant 0 : index
    %107 = vector.load %arg4[%c5_37, %c0_38] : memref<32x32xf32, #tpu.memory_space<vmem>>, vector<16x32xf32>
    %108 = vector.broadcast %106 : f32 to vector<16x32xf32>
    %109 = arith.mulf %108, %107 : vector<16x32xf32>
    %110 = arith.addf %99, %109 : vector<16x32xf32>
    %c8_39 = arith.constant 8 : index
    %111 = memref.load %arg2[%c8_39] : memref<98xf32, #tpu.memory_space<smem>>
    %c6_40 = arith.constant 6 : index
    %c0_41 = arith.constant 0 : index
    %112 = vector.load %arg4[%c6_40, %c0_41] : memref<32x32xf32, #tpu.memory_space<vmem>>, vector<16x32xf32>
    %113 = vector.broadcast %111 : f32 to vector<16x32xf32>
    %114 = arith.mulf %113, %112 : vector<16x32xf32>
    %115 = arith.addf %110, %114 : vector<16x32xf32>
    %c15 = arith.constant 15 : index
    %116 = memref.load %arg2[%c15] : memref<98xf32, #tpu.memory_space<smem>>
    %c7_42 = arith.constant 7 : index
    %c0_43 = arith.constant 0 : index
    %117 = vector.load %arg4[%c7_42, %c0_43] : memref<32x32xf32, #tpu.memory_space<vmem>>, vector<16x32xf32>
    %118 = vector.broadcast %116 : f32 to vector<16x32xf32>
    %119 = arith.mulf %118, %117 : vector<16x32xf32>
    %120 = arith.addf %115, %119 : vector<16x32xf32>
    %c22 = arith.constant 22 : index
    %121 = memref.load %arg2[%c22] : memref<98xf32, #tpu.memory_space<smem>>
    %c8_44 = arith.constant 8 : index
    %c0_45 = arith.constant 0 : index
    %122 = vector.load %arg4[%c8_44, %c0_45] : memref<32x32xf32, #tpu.memory_space<vmem>>, vector<16x32xf32>
    %123 = vector.broadcast %121 : f32 to vector<16x32xf32>
    %124 = arith.mulf %123, %122 : vector<16x32xf32>
    %125 = arith.addf %120, %124 : vector<16x32xf32>
    %c29 = arith.constant 29 : index
    %126 = memref.load %arg2[%c29] : memref<98xf32, #tpu.memory_space<smem>>
    %c9_46 = arith.constant 9 : index
    %c0_47 = arith.constant 0 : index
    %127 = vector.load %arg4[%c9_46, %c0_47] : memref<32x32xf32, #tpu.memory_space<vmem>>, vector<16x32xf32>
    %128 = vector.broadcast %126 : f32 to vector<16x32xf32>
    %129 = arith.mulf %128, %127 : vector<16x32xf32>
    %130 = arith.addf %125, %129 : vector<16x32xf32>
    %c36 = arith.constant 36 : index
    %131 = memref.load %arg2[%c36] : memref<98xf32, #tpu.memory_space<smem>>
    %c10_48 = arith.constant 10 : index
    %c0_49 = arith.constant 0 : index
    %132 = vector.load %arg4[%c10_48, %c0_49] : memref<32x32xf32, #tpu.memory_space<vmem>>, vector<16x32xf32>
    %133 = vector.broadcast %131 : f32 to vector<16x32xf32>
    %134 = arith.mulf %133, %132 : vector<16x32xf32>
    %135 = arith.addf %130, %134 : vector<16x32xf32>
    %c43 = arith.constant 43 : index
    %136 = memref.load %arg2[%c43] : memref<98xf32, #tpu.memory_space<smem>>
    %c11_50 = arith.constant 11 : index
    %c0_51 = arith.constant 0 : index
    %137 = vector.load %arg4[%c11_50, %c0_51] : memref<32x32xf32, #tpu.memory_space<vmem>>, vector<16x32xf32>
    %138 = vector.broadcast %136 : f32 to vector<16x32xf32>
    %139 = arith.mulf %138, %137 : vector<16x32xf32>
    %140 = arith.addf %135, %139 : vector<16x32xf32>
    %141 = vector.extract_strided_slice %20 {offsets = [0, 31], sizes = [16, 1], strides = [1, 1]} : vector<16x32xf32> to vector<16x1xf32>
    %142 = vector.extract_strided_slice %20 {offsets = [0, 0], sizes = [16, 31], strides = [1, 1]} : vector<16x32xf32> to vector<16x31xf32>
    %143 = tpu.concatenate %141, %142 in 1 : vector<16x1xf32>, vector<16x31xf32> -> vector<16x32xf32>
    %cst_52 = arith.constant 0.000000e+00 : f32
    %144 = vector.broadcast %cst_52 : f32 to vector<16x32xf32>
    %145 = arith.select %48, %143, %144 : vector<16x32xi1>, vector<16x32xf32>
    %c8_53 = arith.constant 8 : index
    %c0_54 = arith.constant 0 : index
    %146 = vector.load %arg4[%c8_53, %c0_54] : memref<32x32xf32, #tpu.memory_space<vmem>>, vector<16x32xf32>
    tpu.vector_store %arg4[%c8_53, %c0_54], %145 {strides = array<i32>} : memref<32x32xf32, #tpu.memory_space<vmem>>, vector<16x32xf32>,
    %c2_55 = arith.constant 2 : index
    %147 = memref.load %arg2[%c2_55] : memref<98xf32, #tpu.memory_space<smem>>
    %c5_56 = arith.constant 5 : index
    %c0_57 = arith.constant 0 : index
    %148 = vector.load %arg4[%c5_56, %c0_57] : memref<32x32xf32, #tpu.memory_space<vmem>>, vector<16x32xf32>
    %149 = vector.broadcast %147 : f32 to vector<16x32xf32>
    %150 = arith.mulf %149, %148 : vector<16x32xf32>
    %151 = arith.addf %140, %150 : vector<16x32xf32>
    %c9_58 = arith.constant 9 : index
    %152 = memref.load %arg2[%c9_58] : memref<98xf32, #tpu.memory_space<smem>>
    %c6_59 = arith.constant 6 : index
    %c0_60 = arith.constant 0 : index
    %153 = vector.load %arg4[%c6_59, %c0_60] : memref<32x32xf32, #tpu.memory_space<vmem>>, vector<16x32xf32>
    %154 = vector.broadcast %152 : f32 to vector<16x32xf32>
    %155 = arith.mulf %154, %153 : vector<16x32xf32>
    %156 = arith.addf %151, %155 : vector<16x32xf32>
    %c16 = arith.constant 16 : index
    %157 = memref.load %arg2[%c16] : memref<98xf32, #tpu.memory_space<smem>>
    %c7_61 = arith.constant 7 : index
    %c0_62 = arith.constant 0 : index
    %158 = vector.load %arg4[%c7_61, %c0_62] : memref<32x32xf32, #tpu.memory_space<vmem>>, vector<16x32xf32>
    %159 = vector.broadcast %157 : f32 to vector<16x32xf32>
    %160 = arith.mulf %159, %158 : vector<16x32xf32>
    %161 = arith.addf %156, %160 : vector<16x32xf32>
    %c23 = arith.constant 23 : index
    %162 = memref.load %arg2[%c23] : memref<98xf32, #tpu.memory_space<smem>>
    %c8_63 = arith.constant 8 : index
    %c0_64 = arith.constant 0 : index
    %163 = vector.load %arg4[%c8_63, %c0_64] : memref<32x32xf32, #tpu.memory_space<vmem>>, vector<16x32xf32>
    %164 = vector.broadcast %162 : f32 to vector<16x32xf32>
    %165 = arith.mulf %164, %163 : vector<16x32xf32>
    %166 = arith.addf %161, %165 : vector<16x32xf32>
    %c30 = arith.constant 30 : index
    %167 = memref.load %arg2[%c30] : memref<98xf32, #tpu.memory_space<smem>>
    %c9_65 = arith.constant 9 : index
    %c0_66 = arith.constant 0 : index
    %168 = vector.load %arg4[%c9_65, %c0_66] : memref<32x32xf32, #tpu.memory_space<vmem>>, vector<16x32xf32>
    %169 = vector.broadcast %167 : f32 to vector<16x32xf32>
    %170 = arith.mulf %169, %168 : vector<16x32xf32>
    %171 = arith.addf %166, %170 : vector<16x32xf32>
    %c37 = arith.constant 37 : index
    %172 = memref.load %arg2[%c37] : memref<98xf32, #tpu.memory_space<smem>>
    %c10_67 = arith.constant 10 : index
    %c0_68 = arith.constant 0 : index
    %173 = vector.load %arg4[%c10_67, %c0_68] : memref<32x32xf32, #tpu.memory_space<vmem>>, vector<16x32xf32>
    %174 = vector.broadcast %172 : f32 to vector<16x32xf32>
    %175 = arith.mulf %174, %173 : vector<16x32xf32>
    %176 = arith.addf %171, %175 : vector<16x32xf32>
    %c44 = arith.constant 44 : index
    %177 = memref.load %arg2[%c44] : memref<98xf32, #tpu.memory_space<smem>>
    %c11_69 = arith.constant 11 : index
    %c0_70 = arith.constant 0 : index
    %178 = vector.load %arg4[%c11_69, %c0_70] : memref<32x32xf32, #tpu.memory_space<vmem>>, vector<16x32xf32>
    %179 = vector.broadcast %177 : f32 to vector<16x32xf32>
    %180 = arith.mulf %179, %178 : vector<16x32xf32>
    %181 = arith.addf %176, %180 : vector<16x32xf32>
    %c8_71 = arith.constant 8 : index
    %c0_72 = arith.constant 0 : index
    %182 = vector.load %arg4[%c8_71, %c0_72] : memref<32x32xf32, #tpu.memory_space<vmem>>, vector<16x32xf32>
    tpu.vector_store %arg4[%c8_71, %c0_72], %20 {strides = array<i32>} : memref<32x32xf32, #tpu.memory_space<vmem>>, vector<16x32xf32>,
    %c3_73 = arith.constant 3 : index
    %183 = memref.load %arg2[%c3_73] : memref<98xf32, #tpu.memory_space<smem>>
    %c5_74 = arith.constant 5 : index
    %c0_75 = arith.constant 0 : index
    %184 = vector.load %arg4[%c5_74, %c0_75] : memref<32x32xf32, #tpu.memory_space<vmem>>, vector<16x32xf32>
    %185 = vector.broadcast %183 : f32 to vector<16x32xf32>
    %186 = arith.mulf %185, %184 : vector<16x32xf32>
    %187 = arith.addf %181, %186 : vector<16x32xf32>
    %c10_76 = arith.constant 10 : index
    %188 = memref.load %arg2[%c10_76] : memref<98xf32, #tpu.memory_space<smem>>
    %c6_77 = arith.constant 6 : index
    %c0_78 = arith.constant 0 : index
    %189 = vector.load %arg4[%c6_77, %c0_78] : memref<32x32xf32, #tpu.memory_space<vmem>>, vector<16x32xf32>
    %190 = vector.broadcast %188 : f32 to vector<16x32xf32>
    %191 = arith.mulf %190, %189 : vector<16x32xf32>
    %192 = arith.addf %187, %191 : vector<16x32xf32>
    %c17 = arith.constant 17 : index
    %193 = memref.load %arg2[%c17] : memref<98xf32, #tpu.memory_space<smem>>
    %c7_79 = arith.constant 7 : index
    %c0_80 = arith.constant 0 : index
    %194 = vector.load %arg4[%c7_79, %c0_80] : memref<32x32xf32, #tpu.memory_space<vmem>>, vector<16x32xf32>
    %195 = vector.broadcast %193 : f32 to vector<16x32xf32>
    %196 = arith.mulf %195, %194 : vector<16x32xf32>
    %197 = arith.addf %192, %196 : vector<16x32xf32>
    %c24_81 = arith.constant 24 : index
    %198 = memref.load %arg2[%c24_81] : memref<98xf32, #tpu.memory_space<smem>>
    %c8_82 = arith.constant 8 : index
    %c0_83 = arith.constant 0 : index
    %199 = vector.load %arg4[%c8_82, %c0_83] : memref<32x32xf32, #tpu.memory_space<vmem>>, vector<16x32xf32>
    %200 = vector.broadcast %198 : f32 to vector<16x32xf32>
    %201 = arith.mulf %200, %199 : vector<16x32xf32>
    %202 = arith.addf %197, %201 : vector<16x32xf32>
    %c31 = arith.constant 31 : index
    %203 = memref.load %arg2[%c31] : memref<98xf32, #tpu.memory_space<smem>>
    %c9_84 = arith.constant 9 : index
    %c0_85 = arith.constant 0 : index
    %204 = vector.load %arg4[%c9_84, %c0_85] : memref<32x32xf32, #tpu.memory_space<vmem>>, vector<16x32xf32>
    %205 = vector.broadcast %203 : f32 to vector<16x32xf32>
    %206 = arith.mulf %205, %204 : vector<16x32xf32>
    %207 = arith.addf %202, %206 : vector<16x32xf32>
    %c38 = arith.constant 38 : index
    %208 = memref.load %arg2[%c38] : memref<98xf32, #tpu.memory_space<smem>>
    %c10_86 = arith.constant 10 : index
    %c0_87 = arith.constant 0 : index
    %209 = vector.load %arg4[%c10_86, %c0_87] : memref<32x32xf32, #tpu.memory_space<vmem>>, vector<16x32xf32>
    %210 = vector.broadcast %208 : f32 to vector<16x32xf32>
    %211 = arith.mulf %210, %209 : vector<16x32xf32>
    %212 = arith.addf %207, %211 : vector<16x32xf32>
    %c45 = arith.constant 45 : index
    %213 = memref.load %arg2[%c45] : memref<98xf32, #tpu.memory_space<smem>>
    %c11_88 = arith.constant 11 : index
    %c0_89 = arith.constant 0 : index
    %214 = vector.load %arg4[%c11_88, %c0_89] : memref<32x32xf32, #tpu.memory_space<vmem>>, vector<16x32xf32>
    %215 = vector.broadcast %213 : f32 to vector<16x32xf32>
    %216 = arith.mulf %215, %214 : vector<16x32xf32>
    %217 = arith.addf %212, %216 : vector<16x32xf32>
    %218 = vector.extract_strided_slice %20 {offsets = [0, 1], sizes = [16, 31], strides = [1, 1]} : vector<16x32xf32> to vector<16x31xf32>
    %219 = vector.extract_strided_slice %20 {offsets = [0, 0], sizes = [16, 1], strides = [1, 1]} : vector<16x32xf32> to vector<16x1xf32>
    %220 = tpu.concatenate %218, %219 in 1 : vector<16x31xf32>, vector<16x1xf32> -> vector<16x32xf32>
    %cst_90 = arith.constant 0.000000e+00 : f32
    %221 = vector.broadcast %cst_90 : f32 to vector<16x32xf32>
    %222 = arith.select %50, %220, %221 : vector<16x32xi1>, vector<16x32xf32>
    %c8_91 = arith.constant 8 : index
    %c0_92 = arith.constant 0 : index
    %223 = vector.load %arg4[%c8_91, %c0_92] : memref<32x32xf32, #tpu.memory_space<vmem>>, vector<16x32xf32>
    tpu.vector_store %arg4[%c8_91, %c0_92], %222 {strides = array<i32>} : memref<32x32xf32, #tpu.memory_space<vmem>>, vector<16x32xf32>,
    %c4 = arith.constant 4 : index
    %224 = memref.load %arg2[%c4] : memref<98xf32, #tpu.memory_space<smem>>
    %c5_93 = arith.constant 5 : index
    %c0_94 = arith.constant 0 : index
    %225 = vector.load %arg4[%c5_93, %c0_94] : memref<32x32xf32, #tpu.memory_space<vmem>>, vector<16x32xf32>
    %226 = vector.broadcast %224 : f32 to vector<16x32xf32>
    %227 = arith.mulf %226, %225 : vector<16x32xf32>
    %228 = arith.addf %217, %227 : vector<16x32xf32>
    %c11_95 = arith.constant 11 : index
    %229 = memref.load %arg2[%c11_95] : memref<98xf32, #tpu.memory_space<smem>>
    %c6_96 = arith.constant 6 : index
    %c0_97 = arith.constant 0 : index
    %230 = vector.load %arg4[%c6_96, %c0_97] : memref<32x32xf32, #tpu.memory_space<vmem>>, vector<16x32xf32>
    %231 = vector.broadcast %229 : f32 to vector<16x32xf32>
    %232 = arith.mulf %231, %230 : vector<16x32xf32>
    %233 = arith.addf %228, %232 : vector<16x32xf32>
    %c18 = arith.constant 18 : index
    %234 = memref.load %arg2[%c18] : memref<98xf32, #tpu.memory_space<smem>>
    %c7_98 = arith.constant 7 : index
    %c0_99 = arith.constant 0 : index
    %235 = vector.load %arg4[%c7_98, %c0_99] : memref<32x32xf32, #tpu.memory_space<vmem>>, vector<16x32xf32>
    %236 = vector.broadcast %234 : f32 to vector<16x32xf32>
    %237 = arith.mulf %236, %235 : vector<16x32xf32>
    %238 = arith.addf %233, %237 : vector<16x32xf32>
    %c25 = arith.constant 25 : index
    %239 = memref.load %arg2[%c25] : memref<98xf32, #tpu.memory_space<smem>>
    %c8_100 = arith.constant 8 : index
    %c0_101 = arith.constant 0 : index
    %240 = vector.load %arg4[%c8_100, %c0_101] : memref<32x32xf32, #tpu.memory_space<vmem>>, vector<16x32xf32>
    %241 = vector.broadcast %239 : f32 to vector<16x32xf32>
    %242 = arith.mulf %241, %240 : vector<16x32xf32>
    %243 = arith.addf %238, %242 : vector<16x32xf32>
    %c32 = arith.constant 32 : index
    %244 = memref.load %arg2[%c32] : memref<98xf32, #tpu.memory_space<smem>>
    %c9_102 = arith.constant 9 : index
    %c0_103 = arith.constant 0 : index
    %245 = vector.load %arg4[%c9_102, %c0_103] : memref<32x32xf32, #tpu.memory_space<vmem>>, vector<16x32xf32>
    %246 = vector.broadcast %244 : f32 to vector<16x32xf32>
    %247 = arith.mulf %246, %245 : vector<16x32xf32>
    %248 = arith.addf %243, %247 : vector<16x32xf32>
    %c39 = arith.constant 39 : index
    %249 = memref.load %arg2[%c39] : memref<98xf32, #tpu.memory_space<smem>>
    %c10_104 = arith.constant 10 : index
    %c0_105 = arith.constant 0 : index
    %250 = vector.load %arg4[%c10_104, %c0_105] : memref<32x32xf32, #tpu.memory_space<vmem>>, vector<16x32xf32>
    %251 = vector.broadcast %249 : f32 to vector<16x32xf32>
    %252 = arith.mulf %251, %250 : vector<16x32xf32>
    %253 = arith.addf %248, %252 : vector<16x32xf32>
    %c46 = arith.constant 46 : index
    %254 = memref.load %arg2[%c46] : memref<98xf32, #tpu.memory_space<smem>>
    %c11_106 = arith.constant 11 : index
    %c0_107 = arith.constant 0 : index
    %255 = vector.load %arg4[%c11_106, %c0_107] : memref<32x32xf32, #tpu.memory_space<vmem>>, vector<16x32xf32>
    %256 = vector.broadcast %254 : f32 to vector<16x32xf32>
    %257 = arith.mulf %256, %255 : vector<16x32xf32>
    %258 = arith.addf %253, %257 : vector<16x32xf32>
    %259 = vector.extract_strided_slice %20 {offsets = [0, 2], sizes = [16, 30], strides = [1, 1]} : vector<16x32xf32> to vector<16x30xf32>
    %260 = vector.extract_strided_slice %20 {offsets = [0, 0], sizes = [16, 2], strides = [1, 1]} : vector<16x32xf32> to vector<16x2xf32>
    %261 = tpu.concatenate %259, %260 in 1 : vector<16x30xf32>, vector<16x2xf32> -> vector<16x32xf32>
    %cst_108 = arith.constant 0.000000e+00 : f32
    %262 = vector.broadcast %cst_108 : f32 to vector<16x32xf32>
    %263 = arith.select %52, %261, %262 : vector<16x32xi1>, vector<16x32xf32>
    %c8_109 = arith.constant 8 : index
    %c0_110 = arith.constant 0 : index
    %264 = vector.load %arg4[%c8_109, %c0_110] : memref<32x32xf32, #tpu.memory_space<vmem>>, vector<16x32xf32>
    tpu.vector_store %arg4[%c8_109, %c0_110], %263 {strides = array<i32>} : memref<32x32xf32, #tpu.memory_space<vmem>>, vector<16x32xf32>,
    %c5_111 = arith.constant 5 : index
    %265 = memref.load %arg2[%c5_111] : memref<98xf32, #tpu.memory_space<smem>>
    %c5_112 = arith.constant 5 : index
    %c0_113 = arith.constant 0 : index
    %266 = vector.load %arg4[%c5_112, %c0_113] : memref<32x32xf32, #tpu.memory_space<vmem>>, vector<16x32xf32>
    %267 = vector.broadcast %265 : f32 to vector<16x32xf32>
    %268 = arith.mulf %267, %266 : vector<16x32xf32>
    %269 = arith.addf %258, %268 : vector<16x32xf32>
    %c12 = arith.constant 12 : index
    %270 = memref.load %arg2[%c12] : memref<98xf32, #tpu.memory_space<smem>>
    %c6_114 = arith.constant 6 : index
    %c0_115 = arith.constant 0 : index
    %271 = vector.load %arg4[%c6_114, %c0_115] : memref<32x32xf32, #tpu.memory_space<vmem>>, vector<16x32xf32>
    %272 = vector.broadcast %270 : f32 to vector<16x32xf32>
    %273 = arith.mulf %272, %271 : vector<16x32xf32>
    %274 = arith.addf %269, %273 : vector<16x32xf32>
    %c19 = arith.constant 19 : index
    %275 = memref.load %arg2[%c19] : memref<98xf32, #tpu.memory_space<smem>>
    %c7_116 = arith.constant 7 : index
    %c0_117 = arith.constant 0 : index
    %276 = vector.load %arg4[%c7_116, %c0_117] : memref<32x32xf32, #tpu.memory_space<vmem>>, vector<16x32xf32>
    %277 = vector.broadcast %275 : f32 to vector<16x32xf32>
    %278 = arith.mulf %277, %276 : vector<16x32xf32>
    %279 = arith.addf %274, %278 : vector<16x32xf32>
    %c26 = arith.constant 26 : index
    %280 = memref.load %arg2[%c26] : memref<98xf32, #tpu.memory_space<smem>>
    %c8_118 = arith.constant 8 : index
    %c0_119 = arith.constant 0 : index
    %281 = vector.load %arg4[%c8_118, %c0_119] : memref<32x32xf32, #tpu.memory_space<vmem>>, vector<16x32xf32>
    %282 = vector.broadcast %280 : f32 to vector<16x32xf32>
    %283 = arith.mulf %282, %281 : vector<16x32xf32>
    %284 = arith.addf %279, %283 : vector<16x32xf32>
    %c33 = arith.constant 33 : index
    %285 = memref.load %arg2[%c33] : memref<98xf32, #tpu.memory_space<smem>>
    %c9_120 = arith.constant 9 : index
    %c0_121 = arith.constant 0 : index
    %286 = vector.load %arg4[%c9_120, %c0_121] : memref<32x32xf32, #tpu.memory_space<vmem>>, vector<16x32xf32>
    %287 = vector.broadcast %285 : f32 to vector<16x32xf32>
    %288 = arith.mulf %287, %286 : vector<16x32xf32>
    %289 = arith.addf %284, %288 : vector<16x32xf32>
    %c40 = arith.constant 40 : index
    %290 = memref.load %arg2[%c40] : memref<98xf32, #tpu.memory_space<smem>>
    %c10_122 = arith.constant 10 : index
    %c0_123 = arith.constant 0 : index
    %291 = vector.load %arg4[%c10_122, %c0_123] : memref<32x32xf32, #tpu.memory_space<vmem>>, vector<16x32xf32>
    %292 = vector.broadcast %290 : f32 to vector<16x32xf32>
    %293 = arith.mulf %292, %291 : vector<16x32xf32>
    %294 = arith.addf %289, %293 : vector<16x32xf32>
    %c47 = arith.constant 47 : index
    %295 = memref.load %arg2[%c47] : memref<98xf32, #tpu.memory_space<smem>>
    %c11_124 = arith.constant 11 : index
    %c0_125 = arith.constant 0 : index
    %296 = vector.load %arg4[%c11_124, %c0_125] : memref<32x32xf32, #tpu.memory_space<vmem>>, vector<16x32xf32>
    %297 = vector.broadcast %295 : f32 to vector<16x32xf32>
    %298 = arith.mulf %297, %296 : vector<16x32xf32>
    %299 = arith.addf %294, %298 : vector<16x32xf32>
    %300 = vector.extract_strided_slice %20 {offsets = [0, 3], sizes = [16, 29], strides = [1, 1]} : vector<16x32xf32> to vector<16x29xf32>
    %301 = vector.extract_strided_slice %20 {offsets = [0, 0], sizes = [16, 3], strides = [1, 1]} : vector<16x32xf32> to vector<16x3xf32>
    %302 = tpu.concatenate %300, %301 in 1 : vector<16x29xf32>, vector<16x3xf32> -> vector<16x32xf32>
    %cst_126 = arith.constant 0.000000e+00 : f32
    %303 = vector.broadcast %cst_126 : f32 to vector<16x32xf32>
    %304 = arith.select %54, %302, %303 : vector<16x32xi1>, vector<16x32xf32>
    %c8_127 = arith.constant 8 : index
    %c0_128 = arith.constant 0 : index
    %305 = vector.load %arg4[%c8_127, %c0_128] : memref<32x32xf32, #tpu.memory_space<vmem>>, vector<16x32xf32>
    tpu.vector_store %arg4[%c8_127, %c0_128], %304 {strides = array<i32>} : memref<32x32xf32, #tpu.memory_space<vmem>>, vector<16x32xf32>,
    %c6_129 = arith.constant 6 : index
    %306 = memref.load %arg2[%c6_129] : memref<98xf32, #tpu.memory_space<smem>>
    %c5_130 = arith.constant 5 : index
    %c0_131 = arith.constant 0 : index
    %307 = vector.load %arg4[%c5_130, %c0_131] : memref<32x32xf32, #tpu.memory_space<vmem>>, vector<16x32xf32>
    %308 = vector.broadcast %306 : f32 to vector<16x32xf32>
    %309 = arith.mulf %308, %307 : vector<16x32xf32>
    %310 = arith.addf %299, %309 : vector<16x32xf32>
    %c13 = arith.constant 13 : index
    %311 = memref.load %arg2[%c13] : memref<98xf32, #tpu.memory_space<smem>>
    %c6_132 = arith.constant 6 : index
    %c0_133 = arith.constant 0 : index
    %312 = vector.load %arg4[%c6_132, %c0_133] : memref<32x32xf32, #tpu.memory_space<vmem>>, vector<16x32xf32>
    %313 = vector.broadcast %311 : f32 to vector<16x32xf32>
    %314 = arith.mulf %313, %312 : vector<16x32xf32>
    %315 = arith.addf %310, %314 : vector<16x32xf32>
    %c20 = arith.constant 20 : index
    %316 = memref.load %arg2[%c20] : memref<98xf32, #tpu.memory_space<smem>>
    %c7_134 = arith.constant 7 : index
    %c0_135 = arith.constant 0 : index
    %317 = vector.load %arg4[%c7_134, %c0_135] : memref<32x32xf32, #tpu.memory_space<vmem>>, vector<16x32xf32>
    %318 = vector.broadcast %316 : f32 to vector<16x32xf32>
    %319 = arith.mulf %318, %317 : vector<16x32xf32>
    %320 = arith.addf %315, %319 : vector<16x32xf32>
    %c27 = arith.constant 27 : index
    %321 = memref.load %arg2[%c27] : memref<98xf32, #tpu.memory_space<smem>>
    %c8_136 = arith.constant 8 : index
    %c0_137 = arith.constant 0 : index
    %322 = vector.load %arg4[%c8_136, %c0_137] : memref<32x32xf32, #tpu.memory_space<vmem>>, vector<16x32xf32>
    %323 = vector.broadcast %321 : f32 to vector<16x32xf32>
    %324 = arith.mulf %323, %322 : vector<16x32xf32>
    %325 = arith.addf %320, %324 : vector<16x32xf32>
    %c34 = arith.constant 34 : index
    %326 = memref.load %arg2[%c34] : memref<98xf32, #tpu.memory_space<smem>>
    %c9_138 = arith.constant 9 : index
    %c0_139 = arith.constant 0 : index
    %327 = vector.load %arg4[%c9_138, %c0_139] : memref<32x32xf32, #tpu.memory_space<vmem>>, vector<16x32xf32>
    %328 = vector.broadcast %326 : f32 to vector<16x32xf32>
    %329 = arith.mulf %328, %327 : vector<16x32xf32>
    %330 = arith.addf %325, %329 : vector<16x32xf32>
    %c41 = arith.constant 41 : index
    %331 = memref.load %arg2[%c41] : memref<98xf32, #tpu.memory_space<smem>>
    %c10_140 = arith.constant 10 : index
    %c0_141 = arith.constant 0 : index
    %332 = vector.load %arg4[%c10_140, %c0_141] : memref<32x32xf32, #tpu.memory_space<vmem>>, vector<16x32xf32>
    %333 = vector.broadcast %331 : f32 to vector<16x32xf32>
    %334 = arith.mulf %333, %332 : vector<16x32xf32>
    %335 = arith.addf %330, %334 : vector<16x32xf32>
    %c48 = arith.constant 48 : index
    %336 = memref.load %arg2[%c48] : memref<98xf32, #tpu.memory_space<smem>>
    %c11_142 = arith.constant 11 : index
    %c0_143 = arith.constant 0 : index
    %337 = vector.load %arg4[%c11_142, %c0_143] : memref<32x32xf32, #tpu.memory_space<vmem>>, vector<16x32xf32>
    %338 = vector.broadcast %336 : f32 to vector<16x32xf32>
    %339 = arith.mulf %338, %337 : vector<16x32xf32>
    %340 = arith.addf %335, %339 : vector<16x32xf32>
    %341 = vector.extract_strided_slice %25 {offsets = [0, 29], sizes = [16, 3], strides = [1, 1]} : vector<16x32xf32> to vector<16x3xf32>
    %342 = vector.extract_strided_slice %25 {offsets = [0, 0], sizes = [16, 29], strides = [1, 1]} : vector<16x32xf32> to vector<16x29xf32>
    %343 = tpu.concatenate %341, %342 in 1 : vector<16x3xf32>, vector<16x29xf32> -> vector<16x32xf32>
    %cst_144 = arith.constant 0.000000e+00 : f32
    %344 = vector.broadcast %cst_144 : f32 to vector<16x32xf32>
    %345 = arith.select %44, %343, %344 : vector<16x32xi1>, vector<16x32xf32>
    %c8_145 = arith.constant 8 : index
    %c0_146 = arith.constant 0 : index
    %346 = vector.load %arg4[%c8_145, %c0_146] : memref<32x32xf32, #tpu.memory_space<vmem>>, vector<16x32xf32>
    tpu.vector_store %arg4[%c8_145, %c0_146], %345 {strides = array<i32>} : memref<32x32xf32, #tpu.memory_space<vmem>>, vector<16x32xf32>,
    %c49 = arith.constant 49 : index
    %347 = memref.load %arg2[%c49] : memref<98xf32, #tpu.memory_space<smem>>
    %c5_147 = arith.constant 5 : index
    %c0_148 = arith.constant 0 : index
    %348 = vector.load %arg4[%c5_147, %c0_148] : memref<32x32xf32, #tpu.memory_space<vmem>>, vector<16x32xf32>
    %349 = vector.broadcast %347 : f32 to vector<16x32xf32>
    %350 = arith.mulf %349, %348 : vector<16x32xf32>
    %351 = arith.addf %340, %350 : vector<16x32xf32>
    %c56 = arith.constant 56 : index
    %352 = memref.load %arg2[%c56] : memref<98xf32, #tpu.memory_space<smem>>
    %c6_149 = arith.constant 6 : index
    %c0_150 = arith.constant 0 : index
    %353 = vector.load %arg4[%c6_149, %c0_150] : memref<32x32xf32, #tpu.memory_space<vmem>>, vector<16x32xf32>
    %354 = vector.broadcast %352 : f32 to vector<16x32xf32>
    %355 = arith.mulf %354, %353 : vector<16x32xf32>
    %356 = arith.addf %351, %355 : vector<16x32xf32>
    %c63 = arith.constant 63 : index
    %357 = memref.load %arg2[%c63] : memref<98xf32, #tpu.memory_space<smem>>
    %c7_151 = arith.constant 7 : index
    %c0_152 = arith.constant 0 : index
    %358 = vector.load %arg4[%c7_151, %c0_152] : memref<32x32xf32, #tpu.memory_space<vmem>>, vector<16x32xf32>
    %359 = vector.broadcast %357 : f32 to vector<16x32xf32>
    %360 = arith.mulf %359, %358 : vector<16x32xf32>
    %361 = arith.addf %356, %360 : vector<16x32xf32>
    %c70 = arith.constant 70 : index
    %362 = memref.load %arg2[%c70] : memref<98xf32, #tpu.memory_space<smem>>
    %c8_153 = arith.constant 8 : index
    %c0_154 = arith.constant 0 : index
    %363 = vector.load %arg4[%c8_153, %c0_154] : memref<32x32xf32, #tpu.memory_space<vmem>>, vector<16x32xf32>
    %364 = vector.broadcast %362 : f32 to vector<16x32xf32>
    %365 = arith.mulf %364, %363 : vector<16x32xf32>
    %366 = arith.addf %361, %365 : vector<16x32xf32>
    %c77 = arith.constant 77 : index
    %367 = memref.load %arg2[%c77] : memref<98xf32, #tpu.memory_space<smem>>
    %c9_155 = arith.constant 9 : index
    %c0_156 = arith.constant 0 : index
    %368 = vector.load %arg4[%c9_155, %c0_156] : memref<32x32xf32, #tpu.memory_space<vmem>>, vector<16x32xf32>
    %369 = vector.broadcast %367 : f32 to vector<16x32xf32>
    %370 = arith.mulf %369, %368 : vector<16x32xf32>
    %371 = arith.addf %366, %370 : vector<16x32xf32>
    %c84 = arith.constant 84 : index
    %372 = memref.load %arg2[%c84] : memref<98xf32, #tpu.memory_space<smem>>
    %c10_157 = arith.constant 10 : index
    %c0_158 = arith.constant 0 : index
    %373 = vector.load %arg4[%c10_157, %c0_158] : memref<32x32xf32, #tpu.memory_space<vmem>>, vector<16x32xf32>
    %374 = vector.broadcast %372 : f32 to vector<16x32xf32>
    %375 = arith.mulf %374, %373 : vector<16x32xf32>
    %376 = arith.addf %371, %375 : vector<16x32xf32>
    %c91 = arith.constant 91 : index
    %377 = memref.load %arg2[%c91] : memref<98xf32, #tpu.memory_space<smem>>
    %c11_159 = arith.constant 11 : index
    %c0_160 = arith.constant 0 : index
    %378 = vector.load %arg4[%c11_159, %c0_160] : memref<32x32xf32, #tpu.memory_space<vmem>>, vector<16x32xf32>
    %379 = vector.broadcast %377 : f32 to vector<16x32xf32>
    %380 = arith.mulf %379, %378 : vector<16x32xf32>
    %381 = arith.addf %376, %380 : vector<16x32xf32>
    %382 = vector.extract_strided_slice %25 {offsets = [0, 30], sizes = [16, 2], strides = [1, 1]} : vector<16x32xf32> to vector<16x2xf32>
    %383 = vector.extract_strided_slice %25 {offsets = [0, 0], sizes = [16, 30], strides = [1, 1]} : vector<16x32xf32> to vector<16x30xf32>
    %384 = tpu.concatenate %382, %383 in 1 : vector<16x2xf32>, vector<16x30xf32> -> vector<16x32xf32>
    %cst_161 = arith.constant 0.000000e+00 : f32
    %385 = vector.broadcast %cst_161 : f32 to vector<16x32xf32>
    %386 = arith.select %46, %384, %385 : vector<16x32xi1>, vector<16x32xf32>
    %c8_162 = arith.constant 8 : index
    %c0_163 = arith.constant 0 : index
    %387 = vector.load %arg4[%c8_162, %c0_163] : memref<32x32xf32, #tpu.memory_space<vmem>>, vector<16x32xf32>
    tpu.vector_store %arg4[%c8_162, %c0_163], %386 {strides = array<i32>} : memref<32x32xf32, #tpu.memory_space<vmem>>, vector<16x32xf32>,
    %c50 = arith.constant 50 : index
    %388 = memref.load %arg2[%c50] : memref<98xf32, #tpu.memory_space<smem>>
    %c5_164 = arith.constant 5 : index
    %c0_165 = arith.constant 0 : index
    %389 = vector.load %arg4[%c5_164, %c0_165] : memref<32x32xf32, #tpu.memory_space<vmem>>, vector<16x32xf32>
    %390 = vector.broadcast %388 : f32 to vector<16x32xf32>
    %391 = arith.mulf %390, %389 : vector<16x32xf32>
    %392 = arith.addf %381, %391 : vector<16x32xf32>
    %c57 = arith.constant 57 : index
    %393 = memref.load %arg2[%c57] : memref<98xf32, #tpu.memory_space<smem>>
    %c6_166 = arith.constant 6 : index
    %c0_167 = arith.constant 0 : index
    %394 = vector.load %arg4[%c6_166, %c0_167] : memref<32x32xf32, #tpu.memory_space<vmem>>, vector<16x32xf32>
    %395 = vector.broadcast %393 : f32 to vector<16x32xf32>
    %396 = arith.mulf %395, %394 : vector<16x32xf32>
    %397 = arith.addf %392, %396 : vector<16x32xf32>
    %c64 = arith.constant 64 : index
    %398 = memref.load %arg2[%c64] : memref<98xf32, #tpu.memory_space<smem>>
    %c7_168 = arith.constant 7 : index
    %c0_169 = arith.constant 0 : index
    %399 = vector.load %arg4[%c7_168, %c0_169] : memref<32x32xf32, #tpu.memory_space<vmem>>, vector<16x32xf32>
    %400 = vector.broadcast %398 : f32 to vector<16x32xf32>
    %401 = arith.mulf %400, %399 : vector<16x32xf32>
    %402 = arith.addf %397, %401 : vector<16x32xf32>
    %c71 = arith.constant 71 : index
    %403 = memref.load %arg2[%c71] : memref<98xf32, #tpu.memory_space<smem>>
    %c8_170 = arith.constant 8 : index
    %c0_171 = arith.constant 0 : index
    %404 = vector.load %arg4[%c8_170, %c0_171] : memref<32x32xf32, #tpu.memory_space<vmem>>, vector<16x32xf32>
    %405 = vector.broadcast %403 : f32 to vector<16x32xf32>
    %406 = arith.mulf %405, %404 : vector<16x32xf32>
    %407 = arith.addf %402, %406 : vector<16x32xf32>
    %c78 = arith.constant 78 : index
    %408 = memref.load %arg2[%c78] : memref<98xf32, #tpu.memory_space<smem>>
    %c9_172 = arith.constant 9 : index
    %c0_173 = arith.constant 0 : index
    %409 = vector.load %arg4[%c9_172, %c0_173] : memref<32x32xf32, #tpu.memory_space<vmem>>, vector<16x32xf32>
    %410 = vector.broadcast %408 : f32 to vector<16x32xf32>
    %411 = arith.mulf %410, %409 : vector<16x32xf32>
    %412 = arith.addf %407, %411 : vector<16x32xf32>
    %c85 = arith.constant 85 : index
    %413 = memref.load %arg2[%c85] : memref<98xf32, #tpu.memory_space<smem>>
    %c10_174 = arith.constant 10 : index
    %c0_175 = arith.constant 0 : index
    %414 = vector.load %arg4[%c10_174, %c0_175] : memref<32x32xf32, #tpu.memory_space<vmem>>, vector<16x32xf32>
    %415 = vector.broadcast %413 : f32 to vector<16x32xf32>
    %416 = arith.mulf %415, %414 : vector<16x32xf32>
    %417 = arith.addf %412, %416 : vector<16x32xf32>
    %c92 = arith.constant 92 : index
    %418 = memref.load %arg2[%c92] : memref<98xf32, #tpu.memory_space<smem>>
    %c11_176 = arith.constant 11 : index
    %c0_177 = arith.constant 0 : index
    %419 = vector.load %arg4[%c11_176, %c0_177] : memref<32x32xf32, #tpu.memory_space<vmem>>, vector<16x32xf32>
    %420 = vector.broadcast %418 : f32 to vector<16x32xf32>
    %421 = arith.mulf %420, %419 : vector<16x32xf32>
    %422 = arith.addf %417, %421 : vector<16x32xf32>
    %423 = vector.extract_strided_slice %25 {offsets = [0, 31], sizes = [16, 1], strides = [1, 1]} : vector<16x32xf32> to vector<16x1xf32>
    %424 = vector.extract_strided_slice %25 {offsets = [0, 0], sizes = [16, 31], strides = [1, 1]} : vector<16x32xf32> to vector<16x31xf32>
    %425 = tpu.concatenate %423, %424 in 1 : vector<16x1xf32>, vector<16x31xf32> -> vector<16x32xf32>
    %cst_178 = arith.constant 0.000000e+00 : f32
    %426 = vector.broadcast %cst_178 : f32 to vector<16x32xf32>
    %427 = arith.select %48, %425, %426 : vector<16x32xi1>, vector<16x32xf32>
    %c8_179 = arith.constant 8 : index
    %c0_180 = arith.constant 0 : index
    %428 = vector.load %arg4[%c8_179, %c0_180] : memref<32x32xf32, #tpu.memory_space<vmem>>, vector<16x32xf32>
    tpu.vector_store %arg4[%c8_179, %c0_180], %427 {strides = array<i32>} : memref<32x32xf32, #tpu.memory_space<vmem>>, vector<16x32xf32>,
    %c51 = arith.constant 51 : index
    %429 = memref.load %arg2[%c51] : memref<98xf32, #tpu.memory_space<smem>>
    %c5_181 = arith.constant 5 : index
    %c0_182 = arith.constant 0 : index
    %430 = vector.load %arg4[%c5_181, %c0_182] : memref<32x32xf32, #tpu.memory_space<vmem>>, vector<16x32xf32>
    %431 = vector.broadcast %429 : f32 to vector<16x32xf32>
    %432 = arith.mulf %431, %430 : vector<16x32xf32>
    %433 = arith.addf %422, %432 : vector<16x32xf32>
    %c58 = arith.constant 58 : index
    %434 = memref.load %arg2[%c58] : memref<98xf32, #tpu.memory_space<smem>>
    %c6_183 = arith.constant 6 : index
    %c0_184 = arith.constant 0 : index
    %435 = vector.load %arg4[%c6_183, %c0_184] : memref<32x32xf32, #tpu.memory_space<vmem>>, vector<16x32xf32>
    %436 = vector.broadcast %434 : f32 to vector<16x32xf32>
    %437 = arith.mulf %436, %435 : vector<16x32xf32>
    %438 = arith.addf %433, %437 : vector<16x32xf32>
    %c65 = arith.constant 65 : index
    %439 = memref.load %arg2[%c65] : memref<98xf32, #tpu.memory_space<smem>>
    %c7_185 = arith.constant 7 : index
    %c0_186 = arith.constant 0 : index
    %440 = vector.load %arg4[%c7_185, %c0_186] : memref<32x32xf32, #tpu.memory_space<vmem>>, vector<16x32xf32>
    %441 = vector.broadcast %439 : f32 to vector<16x32xf32>
    %442 = arith.mulf %441, %440 : vector<16x32xf32>
    %443 = arith.addf %438, %442 : vector<16x32xf32>
    %c72 = arith.constant 72 : index
    %444 = memref.load %arg2[%c72] : memref<98xf32, #tpu.memory_space<smem>>
    %c8_187 = arith.constant 8 : index
    %c0_188 = arith.constant 0 : index
    %445 = vector.load %arg4[%c8_187, %c0_188] : memref<32x32xf32, #tpu.memory_space<vmem>>, vector<16x32xf32>
    %446 = vector.broadcast %444 : f32 to vector<16x32xf32>
    %447 = arith.mulf %446, %445 : vector<16x32xf32>
    %448 = arith.addf %443, %447 : vector<16x32xf32>
    %c79 = arith.constant 79 : index
    %449 = memref.load %arg2[%c79] : memref<98xf32, #tpu.memory_space<smem>>
    %c9_189 = arith.constant 9 : index
    %c0_190 = arith.constant 0 : index
    %450 = vector.load %arg4[%c9_189, %c0_190] : memref<32x32xf32, #tpu.memory_space<vmem>>, vector<16x32xf32>
    %451 = vector.broadcast %449 : f32 to vector<16x32xf32>
    %452 = arith.mulf %451, %450 : vector<16x32xf32>
    %453 = arith.addf %448, %452 : vector<16x32xf32>
    %c86 = arith.constant 86 : index
    %454 = memref.load %arg2[%c86] : memref<98xf32, #tpu.memory_space<smem>>
    %c10_191 = arith.constant 10 : index
    %c0_192 = arith.constant 0 : index
    %455 = vector.load %arg4[%c10_191, %c0_192] : memref<32x32xf32, #tpu.memory_space<vmem>>, vector<16x32xf32>
    %456 = vector.broadcast %454 : f32 to vector<16x32xf32>
    %457 = arith.mulf %456, %455 : vector<16x32xf32>
    %458 = arith.addf %453, %457 : vector<16x32xf32>
    %c93 = arith.constant 93 : index
    %459 = memref.load %arg2[%c93] : memref<98xf32, #tpu.memory_space<smem>>
    %c11_193 = arith.constant 11 : index
    %c0_194 = arith.constant 0 : index
    %460 = vector.load %arg4[%c11_193, %c0_194] : memref<32x32xf32, #tpu.memory_space<vmem>>, vector<16x32xf32>
    %461 = vector.broadcast %459 : f32 to vector<16x32xf32>
    %462 = arith.mulf %461, %460 : vector<16x32xf32>
    %463 = arith.addf %458, %462 : vector<16x32xf32>
    %c8_195 = arith.constant 8 : index
    %c0_196 = arith.constant 0 : index
    %464 = vector.load %arg4[%c8_195, %c0_196] : memref<32x32xf32, #tpu.memory_space<vmem>>, vector<16x32xf32>
    tpu.vector_store %arg4[%c8_195, %c0_196], %25 {strides = array<i32>} : memref<32x32xf32, #tpu.memory_space<vmem>>, vector<16x32xf32>,
    %c52 = arith.constant 52 : index
    %465 = memref.load %arg2[%c52] : memref<98xf32, #tpu.memory_space<smem>>
    %c5_197 = arith.constant 5 : index
    %c0_198 = arith.constant 0 : index
    %466 = vector.load %arg4[%c5_197, %c0_198] : memref<32x32xf32, #tpu.memory_space<vmem>>, vector<16x32xf32>
    %467 = vector.broadcast %465 : f32 to vector<16x32xf32>
    %468 = arith.mulf %467, %466 : vector<16x32xf32>
    %469 = arith.addf %463, %468 : vector<16x32xf32>
    %c59 = arith.constant 59 : index
    %470 = memref.load %arg2[%c59] : memref<98xf32, #tpu.memory_space<smem>>
    %c6_199 = arith.constant 6 : index
    %c0_200 = arith.constant 0 : index
    %471 = vector.load %arg4[%c6_199, %c0_200] : memref<32x32xf32, #tpu.memory_space<vmem>>, vector<16x32xf32>
    %472 = vector.broadcast %470 : f32 to vector<16x32xf32>
    %473 = arith.mulf %472, %471 : vector<16x32xf32>
    %474 = arith.addf %469, %473 : vector<16x32xf32>
    %c66 = arith.constant 66 : index
    %475 = memref.load %arg2[%c66] : memref<98xf32, #tpu.memory_space<smem>>
    %c7_201 = arith.constant 7 : index
    %c0_202 = arith.constant 0 : index
    %476 = vector.load %arg4[%c7_201, %c0_202] : memref<32x32xf32, #tpu.memory_space<vmem>>, vector<16x32xf32>
    %477 = vector.broadcast %475 : f32 to vector<16x32xf32>
    %478 = arith.mulf %477, %476 : vector<16x32xf32>
    %479 = arith.addf %474, %478 : vector<16x32xf32>
    %c73 = arith.constant 73 : index
    %480 = memref.load %arg2[%c73] : memref<98xf32, #tpu.memory_space<smem>>
    %c8_203 = arith.constant 8 : index
    %c0_204 = arith.constant 0 : index
    %481 = vector.load %arg4[%c8_203, %c0_204] : memref<32x32xf32, #tpu.memory_space<vmem>>, vector<16x32xf32>
    %482 = vector.broadcast %480 : f32 to vector<16x32xf32>
    %483 = arith.mulf %482, %481 : vector<16x32xf32>
    %484 = arith.addf %479, %483 : vector<16x32xf32>
    %c80 = arith.constant 80 : index
    %485 = memref.load %arg2[%c80] : memref<98xf32, #tpu.memory_space<smem>>
    %c9_205 = arith.constant 9 : index
    %c0_206 = arith.constant 0 : index
    %486 = vector.load %arg4[%c9_205, %c0_206] : memref<32x32xf32, #tpu.memory_space<vmem>>, vector<16x32xf32>
    %487 = vector.broadcast %485 : f32 to vector<16x32xf32>
    %488 = arith.mulf %487, %486 : vector<16x32xf32>
    %489 = arith.addf %484, %488 : vector<16x32xf32>
    %c87 = arith.constant 87 : index
    %490 = memref.load %arg2[%c87] : memref<98xf32, #tpu.memory_space<smem>>
    %c10_207 = arith.constant 10 : index
    %c0_208 = arith.constant 0 : index
    %491 = vector.load %arg4[%c10_207, %c0_208] : memref<32x32xf32, #tpu.memory_space<vmem>>, vector<16x32xf32>
    %492 = vector.broadcast %490 : f32 to vector<16x32xf32>
    %493 = arith.mulf %492, %491 : vector<16x32xf32>
    %494 = arith.addf %489, %493 : vector<16x32xf32>
    %c94 = arith.constant 94 : index
    %495 = memref.load %arg2[%c94] : memref<98xf32, #tpu.memory_space<smem>>
    %c11_209 = arith.constant 11 : index
    %c0_210 = arith.constant 0 : index
    %496 = vector.load %arg4[%c11_209, %c0_210] : memref<32x32xf32, #tpu.memory_space<vmem>>, vector<16x32xf32>
    %497 = vector.broadcast %495 : f32 to vector<16x32xf32>
    %498 = arith.mulf %497, %496 : vector<16x32xf32>
    %499 = arith.addf %494, %498 : vector<16x32xf32>
    %500 = vector.extract_strided_slice %25 {offsets = [0, 1], sizes = [16, 31], strides = [1, 1]} : vector<16x32xf32> to vector<16x31xf32>
    %501 = vector.extract_strided_slice %25 {offsets = [0, 0], sizes = [16, 1], strides = [1, 1]} : vector<16x32xf32> to vector<16x1xf32>
    %502 = tpu.concatenate %500, %501 in 1 : vector<16x31xf32>, vector<16x1xf32> -> vector<16x32xf32>
    %cst_211 = arith.constant 0.000000e+00 : f32
    %503 = vector.broadcast %cst_211 : f32 to vector<16x32xf32>
    %504 = arith.select %50, %502, %503 : vector<16x32xi1>, vector<16x32xf32>
    %c8_212 = arith.constant 8 : index
    %c0_213 = arith.constant 0 : index
    %505 = vector.load %arg4[%c8_212, %c0_213] : memref<32x32xf32, #tpu.memory_space<vmem>>, vector<16x32xf32>
    tpu.vector_store %arg4[%c8_212, %c0_213], %504 {strides = array<i32>} : memref<32x32xf32, #tpu.memory_space<vmem>>, vector<16x32xf32>,
    %c53 = arith.constant 53 : index
    %506 = memref.load %arg2[%c53] : memref<98xf32, #tpu.memory_space<smem>>
    %c5_214 = arith.constant 5 : index
    %c0_215 = arith.constant 0 : index
    %507 = vector.load %arg4[%c5_214, %c0_215] : memref<32x32xf32, #tpu.memory_space<vmem>>, vector<16x32xf32>
    %508 = vector.broadcast %506 : f32 to vector<16x32xf32>
    %509 = arith.mulf %508, %507 : vector<16x32xf32>
    %510 = arith.addf %499, %509 : vector<16x32xf32>
    %c60 = arith.constant 60 : index
    %511 = memref.load %arg2[%c60] : memref<98xf32, #tpu.memory_space<smem>>
    %c6_216 = arith.constant 6 : index
    %c0_217 = arith.constant 0 : index
    %512 = vector.load %arg4[%c6_216, %c0_217] : memref<32x32xf32, #tpu.memory_space<vmem>>, vector<16x32xf32>
    %513 = vector.broadcast %511 : f32 to vector<16x32xf32>
    %514 = arith.mulf %513, %512 : vector<16x32xf32>
    %515 = arith.addf %510, %514 : vector<16x32xf32>
    %c67 = arith.constant 67 : index
    %516 = memref.load %arg2[%c67] : memref<98xf32, #tpu.memory_space<smem>>
    %c7_218 = arith.constant 7 : index
    %c0_219 = arith.constant 0 : index
    %517 = vector.load %arg4[%c7_218, %c0_219] : memref<32x32xf32, #tpu.memory_space<vmem>>, vector<16x32xf32>
    %518 = vector.broadcast %516 : f32 to vector<16x32xf32>
    %519 = arith.mulf %518, %517 : vector<16x32xf32>
    %520 = arith.addf %515, %519 : vector<16x32xf32>
    %c74 = arith.constant 74 : index
    %521 = memref.load %arg2[%c74] : memref<98xf32, #tpu.memory_space<smem>>
    %c8_220 = arith.constant 8 : index
    %c0_221 = arith.constant 0 : index
    %522 = vector.load %arg4[%c8_220, %c0_221] : memref<32x32xf32, #tpu.memory_space<vmem>>, vector<16x32xf32>
    %523 = vector.broadcast %521 : f32 to vector<16x32xf32>
    %524 = arith.mulf %523, %522 : vector<16x32xf32>
    %525 = arith.addf %520, %524 : vector<16x32xf32>
    %c81 = arith.constant 81 : index
    %526 = memref.load %arg2[%c81] : memref<98xf32, #tpu.memory_space<smem>>
    %c9_222 = arith.constant 9 : index
    %c0_223 = arith.constant 0 : index
    %527 = vector.load %arg4[%c9_222, %c0_223] : memref<32x32xf32, #tpu.memory_space<vmem>>, vector<16x32xf32>
    %528 = vector.broadcast %526 : f32 to vector<16x32xf32>
    %529 = arith.mulf %528, %527 : vector<16x32xf32>
    %530 = arith.addf %525, %529 : vector<16x32xf32>
    %c88 = arith.constant 88 : index
    %531 = memref.load %arg2[%c88] : memref<98xf32, #tpu.memory_space<smem>>
    %c10_224 = arith.constant 10 : index
    %c0_225 = arith.constant 0 : index
    %532 = vector.load %arg4[%c10_224, %c0_225] : memref<32x32xf32, #tpu.memory_space<vmem>>, vector<16x32xf32>
    %533 = vector.broadcast %531 : f32 to vector<16x32xf32>
    %534 = arith.mulf %533, %532 : vector<16x32xf32>
    %535 = arith.addf %530, %534 : vector<16x32xf32>
    %c95 = arith.constant 95 : index
    %536 = memref.load %arg2[%c95] : memref<98xf32, #tpu.memory_space<smem>>
    %c11_226 = arith.constant 11 : index
    %c0_227 = arith.constant 0 : index
    %537 = vector.load %arg4[%c11_226, %c0_227] : memref<32x32xf32, #tpu.memory_space<vmem>>, vector<16x32xf32>
    %538 = vector.broadcast %536 : f32 to vector<16x32xf32>
    %539 = arith.mulf %538, %537 : vector<16x32xf32>
    %540 = arith.addf %535, %539 : vector<16x32xf32>
    %541 = vector.extract_strided_slice %25 {offsets = [0, 2], sizes = [16, 30], strides = [1, 1]} : vector<16x32xf32> to vector<16x30xf32>
    %542 = vector.extract_strided_slice %25 {offsets = [0, 0], sizes = [16, 2], strides = [1, 1]} : vector<16x32xf32> to vector<16x2xf32>
    %543 = tpu.concatenate %541, %542 in 1 : vector<16x30xf32>, vector<16x2xf32> -> vector<16x32xf32>
    %cst_228 = arith.constant 0.000000e+00 : f32
    %544 = vector.broadcast %cst_228 : f32 to vector<16x32xf32>
    %545 = arith.select %52, %543, %544 : vector<16x32xi1>, vector<16x32xf32>
    %c8_229 = arith.constant 8 : index
    %c0_230 = arith.constant 0 : index
    %546 = vector.load %arg4[%c8_229, %c0_230] : memref<32x32xf32, #tpu.memory_space<vmem>>, vector<16x32xf32>
    tpu.vector_store %arg4[%c8_229, %c0_230], %545 {strides = array<i32>} : memref<32x32xf32, #tpu.memory_space<vmem>>, vector<16x32xf32>,
    %c54 = arith.constant 54 : index
    %547 = memref.load %arg2[%c54] : memref<98xf32, #tpu.memory_space<smem>>
    %c5_231 = arith.constant 5 : index
    %c0_232 = arith.constant 0 : index
    %548 = vector.load %arg4[%c5_231, %c0_232] : memref<32x32xf32, #tpu.memory_space<vmem>>, vector<16x32xf32>
    %549 = vector.broadcast %547 : f32 to vector<16x32xf32>
    %550 = arith.mulf %549, %548 : vector<16x32xf32>
    %551 = arith.addf %540, %550 : vector<16x32xf32>
    %c61 = arith.constant 61 : index
    %552 = memref.load %arg2[%c61] : memref<98xf32, #tpu.memory_space<smem>>
    %c6_233 = arith.constant 6 : index
    %c0_234 = arith.constant 0 : index
    %553 = vector.load %arg4[%c6_233, %c0_234] : memref<32x32xf32, #tpu.memory_space<vmem>>, vector<16x32xf32>
    %554 = vector.broadcast %552 : f32 to vector<16x32xf32>
    %555 = arith.mulf %554, %553 : vector<16x32xf32>
    %556 = arith.addf %551, %555 : vector<16x32xf32>
    %c68 = arith.constant 68 : index
    %557 = memref.load %arg2[%c68] : memref<98xf32, #tpu.memory_space<smem>>
    %c7_235 = arith.constant 7 : index
    %c0_236 = arith.constant 0 : index
    %558 = vector.load %arg4[%c7_235, %c0_236] : memref<32x32xf32, #tpu.memory_space<vmem>>, vector<16x32xf32>
    %559 = vector.broadcast %557 : f32 to vector<16x32xf32>
    %560 = arith.mulf %559, %558 : vector<16x32xf32>
    %561 = arith.addf %556, %560 : vector<16x32xf32>
    %c75 = arith.constant 75 : index
    %562 = memref.load %arg2[%c75] : memref<98xf32, #tpu.memory_space<smem>>
    %c8_237 = arith.constant 8 : index
    %c0_238 = arith.constant 0 : index
    %563 = vector.load %arg4[%c8_237, %c0_238] : memref<32x32xf32, #tpu.memory_space<vmem>>, vector<16x32xf32>
    %564 = vector.broadcast %562 : f32 to vector<16x32xf32>
    %565 = arith.mulf %564, %563 : vector<16x32xf32>
    %566 = arith.addf %561, %565 : vector<16x32xf32>
    %c82 = arith.constant 82 : index
    %567 = memref.load %arg2[%c82] : memref<98xf32, #tpu.memory_space<smem>>
    %c9_239 = arith.constant 9 : index
    %c0_240 = arith.constant 0 : index
    %568 = vector.load %arg4[%c9_239, %c0_240] : memref<32x32xf32, #tpu.memory_space<vmem>>, vector<16x32xf32>
    %569 = vector.broadcast %567 : f32 to vector<16x32xf32>
    %570 = arith.mulf %569, %568 : vector<16x32xf32>
    %571 = arith.addf %566, %570 : vector<16x32xf32>
    %c89 = arith.constant 89 : index
    %572 = memref.load %arg2[%c89] : memref<98xf32, #tpu.memory_space<smem>>
    %c10_241 = arith.constant 10 : index
    %c0_242 = arith.constant 0 : index
    %573 = vector.load %arg4[%c10_241, %c0_242] : memref<32x32xf32, #tpu.memory_space<vmem>>, vector<16x32xf32>
    %574 = vector.broadcast %572 : f32 to vector<16x32xf32>
    %575 = arith.mulf %574, %573 : vector<16x32xf32>
    %576 = arith.addf %571, %575 : vector<16x32xf32>
    %c96 = arith.constant 96 : index
    %577 = memref.load %arg2[%c96] : memref<98xf32, #tpu.memory_space<smem>>
    %c11_243 = arith.constant 11 : index
    %c0_244 = arith.constant 0 : index
    %578 = vector.load %arg4[%c11_243, %c0_244] : memref<32x32xf32, #tpu.memory_space<vmem>>, vector<16x32xf32>
    %579 = vector.broadcast %577 : f32 to vector<16x32xf32>
    %580 = arith.mulf %579, %578 : vector<16x32xf32>
    %581 = arith.addf %576, %580 : vector<16x32xf32>
    %582 = vector.extract_strided_slice %25 {offsets = [0, 3], sizes = [16, 29], strides = [1, 1]} : vector<16x32xf32> to vector<16x29xf32>
    %583 = vector.extract_strided_slice %25 {offsets = [0, 0], sizes = [16, 3], strides = [1, 1]} : vector<16x32xf32> to vector<16x3xf32>
    %584 = tpu.concatenate %582, %583 in 1 : vector<16x29xf32>, vector<16x3xf32> -> vector<16x32xf32>
    %cst_245 = arith.constant 0.000000e+00 : f32
    %585 = vector.broadcast %cst_245 : f32 to vector<16x32xf32>
    %586 = arith.select %54, %584, %585 : vector<16x32xi1>, vector<16x32xf32>
    %c8_246 = arith.constant 8 : index
    %c0_247 = arith.constant 0 : index
    %587 = vector.load %arg4[%c8_246, %c0_247] : memref<32x32xf32, #tpu.memory_space<vmem>>, vector<16x32xf32>
    tpu.vector_store %arg4[%c8_246, %c0_247], %586 {strides = array<i32>} : memref<32x32xf32, #tpu.memory_space<vmem>>, vector<16x32xf32>,
    %c55 = arith.constant 55 : index
    %588 = memref.load %arg2[%c55] : memref<98xf32, #tpu.memory_space<smem>>
    %c5_248 = arith.constant 5 : index
    %c0_249 = arith.constant 0 : index
    %589 = vector.load %arg4[%c5_248, %c0_249] : memref<32x32xf32, #tpu.memory_space<vmem>>, vector<16x32xf32>
    %590 = vector.broadcast %588 : f32 to vector<16x32xf32>
    %591 = arith.mulf %590, %589 : vector<16x32xf32>
    %592 = arith.addf %581, %591 : vector<16x32xf32>
    %c62 = arith.constant 62 : index
    %593 = memref.load %arg2[%c62] : memref<98xf32, #tpu.memory_space<smem>>
    %c6_250 = arith.constant 6 : index
    %c0_251 = arith.constant 0 : index
    %594 = vector.load %arg4[%c6_250, %c0_251] : memref<32x32xf32, #tpu.memory_space<vmem>>, vector<16x32xf32>
    %595 = vector.broadcast %593 : f32 to vector<16x32xf32>
    %596 = arith.mulf %595, %594 : vector<16x32xf32>
    %597 = arith.addf %592, %596 : vector<16x32xf32>
    %c69 = arith.constant 69 : index
    %598 = memref.load %arg2[%c69] : memref<98xf32, #tpu.memory_space<smem>>
    %c7_252 = arith.constant 7 : index
    %c0_253 = arith.constant 0 : index
    %599 = vector.load %arg4[%c7_252, %c0_253] : memref<32x32xf32, #tpu.memory_space<vmem>>, vector<16x32xf32>
    %600 = vector.broadcast %598 : f32 to vector<16x32xf32>
    %601 = arith.mulf %600, %599 : vector<16x32xf32>
    %602 = arith.addf %597, %601 : vector<16x32xf32>
    %c76 = arith.constant 76 : index
    %603 = memref.load %arg2[%c76] : memref<98xf32, #tpu.memory_space<smem>>
    %c8_254 = arith.constant 8 : index
    %c0_255 = arith.constant 0 : index
    %604 = vector.load %arg4[%c8_254, %c0_255] : memref<32x32xf32, #tpu.memory_space<vmem>>, vector<16x32xf32>
    %605 = vector.broadcast %603 : f32 to vector<16x32xf32>
    %606 = arith.mulf %605, %604 : vector<16x32xf32>
    %607 = arith.addf %602, %606 : vector<16x32xf32>
    %c83 = arith.constant 83 : index
    %608 = memref.load %arg2[%c83] : memref<98xf32, #tpu.memory_space<smem>>
    %c9_256 = arith.constant 9 : index
    %c0_257 = arith.constant 0 : index
    %609 = vector.load %arg4[%c9_256, %c0_257] : memref<32x32xf32, #tpu.memory_space<vmem>>, vector<16x32xf32>
    %610 = vector.broadcast %608 : f32 to vector<16x32xf32>
    %611 = arith.mulf %610, %609 : vector<16x32xf32>
    %612 = arith.addf %607, %611 : vector<16x32xf32>
    %c90 = arith.constant 90 : index
    %613 = memref.load %arg2[%c90] : memref<98xf32, #tpu.memory_space<smem>>
    %c10_258 = arith.constant 10 : index
    %c0_259 = arith.constant 0 : index
    %614 = vector.load %arg4[%c10_258, %c0_259] : memref<32x32xf32, #tpu.memory_space<vmem>>, vector<16x32xf32>
    %615 = vector.broadcast %613 : f32 to vector<16x32xf32>
    %616 = arith.mulf %615, %614 : vector<16x32xf32>
    %617 = arith.addf %612, %616 : vector<16x32xf32>
    %c97 = arith.constant 97 : index
    %618 = memref.load %arg2[%c97] : memref<98xf32, #tpu.memory_space<smem>>
    %c11_260 = arith.constant 11 : index
    %c0_261 = arith.constant 0 : index
    %619 = vector.load %arg4[%c11_260, %c0_261] : memref<32x32xf32, #tpu.memory_space<vmem>>, vector<16x32xf32>
    %620 = vector.broadcast %618 : f32 to vector<16x32xf32>
    %621 = arith.mulf %620, %619 : vector<16x32xf32>
    %622 = arith.addf %617, %621 : vector<16x32xf32>
    %623 = arith.negf %622 : vector<16x32xf32>
    %624 = math.exp %623 : vector<16x32xf32>
    %cst_262 = arith.constant 1.000000e+00 : f32
    %625 = vector.broadcast %cst_262 : f32 to vector<16x32xf32>
    %626 = arith.addf %625, %624 : vector<16x32xf32>
    %627 = arith.divf %625, %626 : vector<16x32xf32>
    %c0_263 = arith.constant 0 : index
    %c0_264 = arith.constant 0 : index
    %c0_265 = arith.constant 0 : index
    %628 = vector.load %arg3[%c0_263, %c0_264, %c0_265] : memref<1x16x32xf32, #tpu.memory_space<vmem>>, vector<1x16x32xf32>
    %629 = vector.shape_cast %628 : vector<1x16x32xf32> to vector<16x32xf32>
    %630 = vector.shape_cast %627 : vector<16x32xf32> to vector<1x16x32xf32>
    tpu.vector_store %arg3[%c0_263, %c0_264, %c0_265], %630 {strides = array<i32>} : memref<1x16x32xf32, #tpu.memory_space<vmem>>, vector<1x16x32xf32>,
    return
  }
  func.func @transform_0(%arg0: i32) -> (i32, i32, i32, i32) {
    %c0_i32 = arith.constant 0 : i32
    %c0_i32_0 = arith.constant 0 : i32
    %c0_i32_1 = arith.constant 0 : i32
    %c0_i32_2 = arith.constant 0 : i32
    return %arg0, %c0_i32, %c0_i32_0, %c0_i32_1 : i32, i32, i32, i32
  }
  func.func @transform_1(%arg0: i32) -> i32 {
    %c0_i32 = arith.constant 0 : i32
    %c0_i32_0 = arith.constant 0 : i32
    return %c0_i32 : i32
  }
  func.func @transform_2(%arg0: i32) -> (i32, i32, i32) {
    %c0_i32 = arith.constant 0 : i32
    %c0_i32_0 = arith.constant 0 : i32
    %c0_i32_1 = arith.constant 0 : i32
    return %arg0, %c0_i32, %c0_i32_0 : i32, i32, i32
  }
}

</mosaic_0001>

<bundles_post_ra>
// kernel: tpu_custom_call.1
= control target key start
LH: loop header
LB: loop body
LE: loop exit
PB: predicated region body
PF: predicated region fallthrough
CT: control target
= control target key end

     0   :  { %7 = vsyncpa [#allocation4], 0  ;;  %s2102_s0 = inlined_call_operand.hbm [shape: f32[2,4,16,16], index: 0, kind: input, shape index: {}]   ;;  %s2103_s1 = inlined_call_operand.vmem [shape: f32[98], index: 1, kind: input, shape index: {}]   ;;  %s2104_s2 = inlined_call_operand.hbm [shape: f32[1,16,32], index: 2, kind: output, shape index: {}]  }
   0x1   :  { %8 = vsyncpa [#allocation6], 0 }
   0x2   :  { %9 = vsyncpa [#allocation5], 0  ;;  %s1360_s9 = smov [#allocation3]   ;;  %s28_s13 = sshll.u32 %s2103_s1, 4  ;;  %s29_s13 = int_to_ptr.vmem [resolvable:$true] %s28_s13 }
   0x3   :  { %s15_s10 = sshll.u32 %s1360_s9, 4  ;;  %s16_s10 = int_to_ptr.vmem [resolvable:$true] %s15_s10 }
   0x4   :  { %s1310_s14 = scalar_lea.vmem %s16_s10, 2048  ;;  %p1315_p1 = scmp.lt.s32.totalorder %s16_s10, %s16_s10 }
   0x5   :  { %p1311_p0 = scmp.ne.s32.totalorder %s16_s10, %s1310_s14  ;;  %p1316_p2 = scmp.lt.s32.totalorder %s1310_s14, %s1310_s14 }
   0x7   :  { %p1317_p3 = por %p1316_p2, %p1315_p1 }
   0x9   :  { %p1318_p4 = pnand %p1317_p3, %p1311_p0 }
   0xb   :  { %1321 = shalt.err (!%p1318_p4)
}
   0xc   :  { %s1361_s15 = smov 128   ;;  %s1362_s16 = smov 8  }
   0xd   :  { %21 = dma.hbm_to_vmem [thread:$0]  %s2102_s0, 2048, %s16_s10, [#allocation4], %s1361_s15, %s1361_s15, %s1362_s16  }
   0xe   :  { %s1322_s19 = scalar_lea.vmem %s29_s13, 16  ;;  %p1327_p6 = scmp.lt.s32.totalorder %s29_s13, %s29_s13 }
   0xf   :  { %p1323_p5 = scmp.ne.s32.totalorder %s29_s13, %s1322_s19  ;;  %p1328_p7 = scmp.lt.s32.totalorder %s1322_s19, %s1322_s19 }
  0x11   :  { %p1329_p8 = por %p1328_p7, %p1327_p6 }
  0x13   :  { %p1330_p9 = pnand %p1329_p8, %p1323_p5 }
  0x15   :  { %1333 = shalt.err (!%p1330_p9)
}
  0x16   :  { %s1363_s1 = smov [#allocation7]  }
  0x17   :  { %31 = dma.vmem_to_smem %s29_s13, 16, %s1363_s1, [#allocation6]  }
  0x18   :  { %1354 = dma.done.wait [#allocation4], 2048  }
  0x19   :  { %1355 = vsyncadd [#allocation4], 4294965248 }
  0x1a   :  { %1356 = dma.done.wait [#allocation6], 16  }
  0x1b   :  { %1357 = vsyncadd [#allocation6], 4294967280 }
  0x1c   :  { %38 = sfence }
  0x1d   :  { %v41_v0 = vld [vmem:[#allocation3 + $0x40] sm:$0xff]  ;;  %v46_v1 = vld [vmem:[#allocation3 + $0x50] sm:$0xff]  ;;  %v42_v4 = vld [vmem:[#allocation3 + $0x48] sm:$0xff]  ;;  %s1364_s0 = smov 16   ;;  %vm127_vm0 = vcmask 261120   ;;  %v1365_v30 = vmov 0.0   ;;  %v107_v43 = vlaneseq }
  0x1e   :  { %v59_v2 = vld [vmem:[#allocation3 + $0x60] sm:$0xff]  ;;  %v50_v3 = vadd.f32 %v46_v1, %v41_v0  ;;  %v47_v5 = vld [vmem:[#allocation3 + $0x58] sm:$0xff]  ;;  %v72_v6 = vld [vmem:[#allocation3 + $0x70] sm:$0xff]  ;;  %v54_v16 = vmax.f32 %v41_v0, %v46_v1  ;;  %128 = vst.msk [vmem:[#allocation2] sm:$0xff] %vm127_vm0, %v1365_v30  ;;  %vm94_vm1 = vcmask 130048   ;;  %s1366_s20 = smov 3  }
  0x1f   :  { %v51_v7 = vadd.f32 %v47_v5, %v42_v4  ;;  %v60_v8 = vld [vmem:[#allocation3 + $0x68] sm:$0xff]  ;;  %v1403_v10 = vld [vmem:[#allocation3 + $0x78] sm:$0xff]  ;;  %v55_v19 = vmax.f32 %v42_v4, %v47_v5  ;;  %v1409_v22 = vld [vmem:[#allocation3 + $0x10] sm:$0xff]  ;;  %129 = vst.msk [vmem:[#allocation2 + $0x18] sm:$0xff] %vm127_vm0, %v1365_v30  ;;  %s1367_s21 = smov 99   ;;  %s1368_s22 = smov 98  }
  0x20   :  { %v63_v9 = vadd.f32 %v59_v2, %v50_v3  ;;  %v67_v17 = vmax.f32 %v54_v16, %v59_v2  ;;  %v1411_v23 = vld [vmem:[#allocation3] sm:$0xff]  ;;  %v1417_v26 = vld [vmem:[#allocation3 + $0x18] sm:$0xff]  ;;  %v1419_v27 = vld [vmem:[#allocation3 + $0x8] sm:$0xff]  ;;  %s1369_s23 = smov 2   ;;  %s1370_s24 = smov 97   ;;  %v108_v44 = vand.u32 127, %v107_v43 }
  0x21   :  { %v64_v11 = vadd.f32 %v60_v8, %v51_v7  ;;  %v68_v20 = vmax.f32 %v55_v19, %v60_v8  ;;  %v48_v24 = vadd.f32 %v1409_v22, %v1411_v23  ;;  %v1415_v25 = vld [vmem:[#allocation3 + $0x20] sm:$0xff]  ;;  %v49_v29 = vadd.f32 %v1417_v26, %v1419_v27  ;;  %v1426_v31 = vld [vmem:[#allocation3 + $0x30] sm:$0xff]  ;;  %v1428_v32 = vld [vmem:[#allocation3 + $0x28] sm:$0xff]  ;;  %s1371_s25 = smov 1   ;;  %s1372_s26 = smov 127  }
  0x22   :  { %v76_v12 = vadd.f32 %v72_v6, %v63_v9  ;;  %v80_v18 = vmax.f32 %v67_v17, %v72_v6  ;;  %v1432_v35 = vld [vmem:[#allocation3 + $0x38] sm:$0xff]  ;;  %s1373_s27 = smov 31   ;;  %s1374_s28 = smov 126   ;;  %v1491_v45 = vand.u32 15, %v108_v44  ;;  %vm144_vm2 = vcmask 23552  }
  0x23   :  { %v77_v13 = vadd.f32 %v1403_v10, %v64_v11  ;;  %v81_v21 = vmax.f32 %v68_v20, %v1403_v10  ;;  %v61_v28 = vadd.f32 %v1415_v25, %v48_v24  ;;  %v62_v34 = vadd.f32 %v1428_v32, %v49_v29  ;;  %s1375_s29 = smov 30   ;;  %s1376_s30 = smov 125  }
  0x24   :  { %v84_v14 = vmul.f32 0.25, %v76_v12  ;;  %s1377_s3 = smov 29   ;;  %vm121_vm3 = vcmp.ge.s32.totalorder %v1491_v45, 3  ;;  %s1494_s4 = sld [smem:[#allocation7]]  ;;  %v52_v60 = vmax.f32 %v1411_v23, %v1409_v22  ;;  %vm219_vm4 = vcmask 15360  }
  0x25   :  { %v85_v15 = vmul.f32 0.25, %v77_v13  ;;  %v74_v33 = vadd.f32 %v1426_v31, %v61_v28  ;;  %v75_v37 = vadd.f32 %v1432_v35, %v62_v34  ;;  %s1496_s5 = sld [smem:[#allocation7 + $0x7]]  ;;  %vm122_vm5 = vcmp.ge.s32.totalorder %v1491_v45, 2 }
  0x26   :  { %88 = vrot.lane.b32.xlu0 %v84_v14, %s1364_s0  ;;  %s1501_s6 = sld [smem:[#allocation7 + $0xe]]  ;;  %v65_v5 = vmax.f32 %v52_v60, %v1415_v25  ;;  %vm294_vm6 = vcmask 7168   ;;  %vm123_vm7 = vcmp.ge.s32.totalorder %v1491_v45, 1  ;;  %vm427_vm8 = vcmask 252928  }
  0x27   :  { %v82_v36 = vmul.f32 0.25, %v74_v33  ;;  %v83_v40 = vmul.f32 0.25, %v75_v37  ;;  %s1504_s7 = sld [smem:[#allocation7 + $0x15]]  ;;  %vm124_vm9 = vcmp.lt.s32.totalorder %v1491_v45, 15  ;;  %vm502_vm10 = vcmask 244736  }
  0x28   :  { %s1508_s8 = sld [smem:[#allocation7 + $0x1c]]  ;;  %vm125_vm11 = vcmp.lt.s32.totalorder %v1491_v45, 14  ;;  %vm577_vm12 = vcmask 236544   ;;  %vm126_vm13 = vcmp.lt.s32.totalorder %v1491_v45, 13 }
  0x29   :  { %s1517_s9 = sld [smem:[#allocation7 + $0x23]] }
  0x2a   :  { %90 = vrot.lane.b32.xlu0 %v85_v15, %s1364_s0  ;;  %v154_v52 = vstv %s1494_s4  ;;  %s1523_s10 = sld [smem:[#allocation7 + $0x2a]] }
  0x2b   :  { %v162_v53 = vstv %s1496_s5  ;;  %s1529_s11 = sld [smem:[#allocation7 + $0x1]] }
  0x2c   :  { %v170_v61 = vstv %s1501_s6  ;;  %s1537_s12 = sld [smem:[#allocation7 + $0x8]] }
  0x2d   :  { %v178_v6 = vstv %s1504_s7  ;;  %s1539_s13 = sld [smem:[#allocation7 + $0xf]] }
  0x2e   :  { %v186_v12 = vstv %s1508_s8  ;;  %s1542_s14 = sld [smem:[#allocation7 + $0x16]] }
  0x2f   :  { %v194_v29 = vstv %s1517_s9  ;;  %s1554_s17 = sld [smem:[#allocation7 + $0x1d]] }
  0x30   :  { %s1564_s18 = sld [smem:[#allocation7 + $0x24]] }
  0x31   :  { %s1568_s19 = sld [smem:[#allocation7 + $0x2b]] }
  0x32   :  { %s1577_s1 = sld [smem:[#allocation7 + $0x2]] }
  0x33   :  { %s1592_s4 = sld [smem:[#allocation7 + $0x10]] }
  0x34   :  { %s1595_s5 = sld [smem:[#allocation7 + $0x17]] }
  0x35   :  { %s1605_s6 = sld [smem:[#allocation7 + $0x25]] }
  0x36   :  { %s1626_s7 = sld [smem:[#allocation7 + $0xa]] }
  0x37   :  { %s1631_s8 = sld [smem:[#allocation7 + $0x11]] }
  0x38   :  { %s1661_s9 = sld [smem:[#allocation7 + $0x26]] }
  0x98   :  { %v89_v38 = vpop.permute.xlu0 %88 }
  0x99   :  { %v1436_v39 = vsel %vm94_vm1, %v82_v36, %v89_v38 }
  0x9a   :  { %138 = vrot.lane.b32.xlu0 %v1436_v39, %s1366_s20  ;;  %132 = vrot.lane.b32.xlu1 %v1436_v39, %s1367_s21 }
  0x9c   :  { %v91_v41 = vpop.permute.xlu0 %90 }
  0x9d   :  { %v1443_v42 = vsel %vm94_vm1, %v83_v40, %v91_v41 }
  0x9e   :  { %207 = vrot.lane.b32.xlu0 %v1436_v39, %s1368_s22  ;;  %134 = vrot.lane.b32.xlu1 %v1443_v42, %s1367_s21 }
  0xa2   :  { %213 = vrot.lane.b32.xlu0 %v1436_v39, %s1369_s23  ;;  %140 = vrot.lane.b32.xlu1 %v1443_v42, %s1366_s20 }
  0xa6   :  { %282 = vrot.lane.b32.xlu0 %v1436_v39, %s1370_s24  ;;  %209 = vrot.lane.b32.xlu1 %v1443_v42, %s1368_s22 }
  0xaa   :  { %288 = vrot.lane.b32.xlu0 %v1436_v39, %s1371_s25  ;;  %215 = vrot.lane.b32.xlu1 %v1443_v42, %s1369_s23 }
  0xae   :  { %99 = vrot.lane.b32.xlu0 %v80_v18, %s1364_s0  ;;  %284 = vrot.lane.b32.xlu1 %v1443_v42, %s1370_s24  ;;  %v78_v18 = vmax.f32 %v65_v5, %v1426_v31 }
  0xb2   :  { %415 = vrot.lane.b32.xlu0 %v1436_v39, %s1372_s26  ;;  %290 = vrot.lane.b32.xlu1 %v1443_v42, %s1371_s25 }
  0xb6   :  { %421 = vrot.lane.b32.xlu0 %v1436_v39, %s1373_s27  ;;  %101 = vrot.lane.b32.xlu1 %v81_v21, %s1364_s0  ;;  %s1582_s0 = sld [smem:[#allocation7 + $0x9]] }
  0xba   :  { %490 = vrot.lane.b32.xlu0 %v1436_v39, %s1374_s28  ;;  %417 = vrot.lane.b32.xlu1 %v1443_v42, %s1372_s26 }
  0xbe   :  { %496 = vrot.lane.b32.xlu0 %v1436_v39, %s1375_s29  ;;  %423 = vrot.lane.b32.xlu1 %v1443_v42, %s1373_s27 }
  0xc2   :  { %565 = vrot.lane.b32.xlu0 %v1436_v39, %s1376_s30  ;;  %492 = vrot.lane.b32.xlu1 %v1443_v42, %s1374_s28 }
  0xc6   :  { %571 = vrot.lane.b32.xlu0 %v1436_v39, %s1377_s3  ;;  %498 = vrot.lane.b32.xlu1 %v1443_v42, %s1375_s29 }
  0xca   :  { %567 = vrot.lane.b32.xlu1 %v1443_v42, %s1376_s30 }
  0xce   :  { %573 = vrot.lane.b32.xlu1 %v1443_v42, %s1377_s3 }
 0x10c   :  { %v139_v46 = vpop.permute.xlu0 %138  ;;  %v133_v47 = vpop.permute.xlu1 %132 }
 0x10d   :  { %v145_v48 = vsel %vm144_vm2, %v133_v47, %v139_v46  ;;  %v53_v46 = vmax.f32 %v1419_v27, %v1417_v26 }
 0x10e   :  { %v147_v49 = vsel %vm121_vm3, %v145_v48, 0.0 }
 0x10f   :  { %149 = vst.msk [vmem:[#allocation2 + $0x8] sm:$0xff] %vm127_vm0, %v147_v49 }
 0x110   :  { %v208_v50 = vpop.permute.xlu0 %207  ;;  %v135_v51 = vpop.permute.xlu1 %134 }
 0x114   :  { %v214_v54 = vpop.permute.xlu0 %213  ;;  %v141_v55 = vpop.permute.xlu1 %140 }
 0x115   :  { %v146_v56 = vsel %vm144_vm2, %v135_v51, %v141_v55  ;;  %v220_v11 = vsel %vm219_vm4, %v208_v50, %v214_v54  ;;  %v202_v50 = vstv %s1523_s10  ;;  %v229_v55 = vstv %s1529_s11  ;;  %s1678_s10 = sld [smem:[#allocation7 + $0x4]] }
 0x116   :  { %v152_v57 = vld [vmem:[#allocation2 + $0x5] sm:$0xff]  ;;  %v148_v59 = vsel %vm121_vm3, %v146_v56, 0.0  ;;  %v222_v28 = vsel %vm122_vm5, %v220_v11, 0.0  ;;  %v66_v56 = vmax.f32 %v53_v46, %v1428_v32  ;;  %v277_v46 = vstv %s1568_s19  ;;  %s1739_s11 = sld [smem:[#allocation7 + $0x20]] }
 0x117   :  { %v160_v58 = vld [vmem:[#allocation2 + $0x6] sm:$0xff]  ;;  %v155_v62 = vmul.f32 %v154_v52, %v152_v57  ;;  %150 = vst.msk [vmem:[#allocation2 + $0x10] sm:$0xff] %vm127_vm0, %v148_v59  ;;  %v237_v59 = vstv %s1537_s12  ;;  %s1789_s12 = sld [smem:[#allocation7 + $0xc]] }
 0x118   :  { %v163_v63 = vmul.f32 %v162_v53, %v160_v58  ;;  %v168_v0 = vld [vmem:[#allocation2 + $0x7] sm:$0xff]  ;;  %v1519_v1 = vpop.permute.xlu0 %282  ;;  %v210_v2 = vpop.permute.xlu1 %209  ;;  %s1810_s19 = sld [smem:[#allocation7 + $0x2f]] }
 0x119   :  { %v171_v4 = vmul.f32 %v170_v61, %v168_v0  ;;  %v176_v7 = vld [vmem:[#allocation2 + $0x8] sm:$0xff] }
 0x11a   :  { %v165_v3 = vadd.f32 %v163_v63, %v155_v62  ;;  %v179_v14 = vmul.f32 %v178_v6, %v176_v7  ;;  %v245_v7 = vstv %s1539_s13  ;;  %s1794_s13 = sld [smem:[#allocation7 + $0x13]] }
 0x11c   :  { %v173_v8 = vadd.f32 %v171_v4, %v165_v3  ;;  %v289_v9 = vpop.permute.xlu0 %288  ;;  %v216_v10 = vpop.permute.xlu1 %215 }
 0x11d   :  { %v221_v13 = vsel %vm219_vm4, %v210_v2, %v216_v10  ;;  %v295_v63 = vsel %vm294_vm6, %v1519_v1, %v289_v9  ;;  %v79_v1 = vmax.f32 %v66_v56, %v1432_v35 }
 0x11e   :  { %v153_v15 = vld [vmem:[#allocation2 + $0xd] sm:$0xff]  ;;  %v223_v24 = vsel %vm122_vm5, %v221_v13, 0.0  ;;  %v181_v25 = vadd.f32 %v179_v14, %v173_v8  ;;  %v253_v8 = vstv %s1542_s14  ;;  %s1798_s14 = sld [smem:[#allocation7 + $0x1a]] }
 0x11f   :  { %v161_v16 = vld [vmem:[#allocation2 + $0xe] sm:$0xff]  ;;  %v156_v19 = vmul.f32 %v154_v52, %v153_v15 }
 0x120   :  { %v169_v17 = vld [vmem:[#allocation2 + $0xf] sm:$0xff]  ;;  %v164_v20 = vmul.f32 %v162_v53, %v161_v16  ;;  %v100_v31 = vpop.permute.xlu0 %99  ;;  %v285_v37 = vpop.permute.xlu1 %284 }
 0x121   :  { %v177_v21 = vld [vmem:[#allocation2 + $0x10] sm:$0xff]  ;;  %v172_v40 = vmul.f32 %v170_v61, %v169_v17  ;;  %v1546_v44 = vsel %vm94_vm1, %v78_v18, %v100_v31 }
 0x122   :  { %v184_v22 = vld [vmem:[#allocation2 + $0x9] sm:$0xff]  ;;  %v185_v23 = vld [vmem:[#allocation2 + $0x11] sm:$0xff]  ;;  %v166_v38 = vadd.f32 %v164_v20, %v156_v19  ;;  %v180_v48 = vmul.f32 %v178_v6, %v177_v21  ;;  %642 = vrot.lane.b32.xlu0 %v1546_v44, %s1367_s21  ;;  %v297_v21 = vsel %vm123_vm7, %v295_v63, 0.0 }
 0x123   :  { %v187_v30 = vmul.f32 %v186_v12, %v184_v22  ;;  %v192_v33 = vld [vmem:[#allocation2 + $0xa] sm:$0xff]  ;;  %v193_v34 = vld [vmem:[#allocation2 + $0x12] sm:$0xff]  ;;  %v188_v53 = vmul.f32 %v186_v12, %v185_v23 }
 0x124   :  { %v200_v36 = vld [vmem:[#allocation2 + $0xb] sm:$0xff]  ;;  %v201_v41 = vld [vmem:[#allocation2 + $0x13] sm:$0xff]  ;;  %v174_v47 = vadd.f32 %v172_v40, %v166_v38  ;;  %v195_v49 = vmul.f32 %v194_v29, %v192_v33  ;;  %v291_v51 = vpop.permute.xlu1 %290  ;;  %v196_v26 = vmul.f32 %v194_v29, %v193_v34 }
 0x125   :  { %224 = vst.msk [vmem:[#allocation2 + $0x8] sm:$0xff] %vm127_vm0, %v222_v28  ;;  %v189_v43 = vadd.f32 %v187_v30, %v181_v25  ;;  %225 = vst.msk [vmem:[#allocation2 + $0x10] sm:$0xff] %vm127_vm0, %v223_v24  ;;  %v203_v27 = vmul.f32 %v202_v50, %v200_v36  ;;  %v296_v58 = vsel %vm294_vm6, %v285_v37, %v291_v51  ;;  %v261_v30 = vstv %s1554_s17  ;;  %s1802_s17 = sld [smem:[#allocation7 + $0x21]] }
 0x126   :  { %v182_v52 = vadd.f32 %v180_v48, %v174_v47  ;;  %648 = vrot.lane.b32.xlu0 %v1546_v44, %s1366_s20  ;;  %v204_v0 = vmul.f32 %v202_v50, %v201_v41  ;;  %v298_v13 = vsel %vm123_vm7, %v296_v58, 0.0  ;;  %v269_v37 = vstv %s1564_s18  ;;  %s1806_s18 = sld [smem:[#allocation7 + $0x28]] }
 0x127   :  { %v197_v54 = vadd.f32 %v195_v49, %v189_v43  ;;  %v304_v51 = vstv %s1577_s1  ;;  %s1815_s1 = sld [smem:[#allocation7 + $0x6]] }
 0x128   :  { %v190_v57 = vadd.f32 %v188_v53, %v182_v52  ;;  %v102_v20 = vpop.permute.xlu1 %101 }
 0x129   :  { %v205_v2 = vadd.f32 %v203_v27, %v197_v54  ;;  %v1585_v33 = vsel %vm94_vm1, %v79_v1, %v102_v20 }
 0x12a   :  { %v198_v32 = vadd.f32 %v196_v26, %v190_v57  ;;  %716 = vrot.lane.b32.xlu0 %v1546_v44, %s1368_s22  ;;  %644 = vrot.lane.b32.xlu1 %v1585_v33, %s1367_s21  ;;  %s1602_s21 = sld [smem:[#allocation7 + $0x1e]] }
 0x12c   :  { %v227_v60 = vld [vmem:[#allocation2 + $0x5] sm:$0xff]  ;;  %v228_v5 = vld [vmem:[#allocation2 + $0xd] sm:$0xff]  ;;  %v206_v9 = vadd.f32 %v204_v0, %v198_v32 }
 0x12d   :  { %v235_v61 = vld [vmem:[#allocation2 + $0x6] sm:$0xff]  ;;  %v230_v3 = vmul.f32 %v229_v55, %v227_v60  ;;  %v236_v6 = vld [vmem:[#allocation2 + $0xe] sm:$0xff]  ;;  %v231_v16 = vmul.f32 %v229_v55, %v228_v5  ;;  %v312_v60 = vstv %s1582_s0  ;;  %s1820_s0 = sld [smem:[#allocation7 + $0xd]] }
 0x12e   :  { %v243_v62 = vld [vmem:[#allocation2 + $0x7] sm:$0xff]  ;;  %v244_v10 = vld [vmem:[#allocation2 + $0xf] sm:$0xff]  ;;  %v238_v15 = vmul.f32 %v237_v59, %v235_v61  ;;  %v239_v28 = vmul.f32 %v237_v59, %v236_v6  ;;  %722 = vrot.lane.b32.xlu0 %v1546_v44, %s1369_s23  ;;  %650 = vrot.lane.b32.xlu1 %v1585_v33, %s1366_s20  ;;  %s1610_s20 = sld [smem:[#allocation7 + $0x2c]] }
 0x12f   :  { %v251_v4 = vld [vmem:[#allocation2 + $0x8] sm:$0xff]  ;;  %v252_v11 = vld [vmem:[#allocation2 + $0x10] sm:$0xff]  ;;  %v232_v14 = vadd.f32 %v230_v3, %v205_v2  ;;  %v246_v24 = vmul.f32 %v245_v7, %v243_v62  ;;  %v233_v25 = vadd.f32 %v231_v16, %v206_v9  ;;  %v247_v31 = vmul.f32 %v245_v7, %v244_v10 }
 0x130   :  { %v259_v12 = vld [vmem:[#allocation2 + $0x9] sm:$0xff]  ;;  %v260_v17 = vld [vmem:[#allocation2 + $0x11] sm:$0xff]  ;;  %v254_v29 = vmul.f32 %v253_v8, %v251_v4  ;;  %v255_v41 = vmul.f32 %v253_v8, %v252_v11  ;;  %v416_v4 = vpop.permute.xlu0 %415  ;;  %v418_v8 = vpop.permute.xlu1 %417  ;;  %v320_v10 = vstv %s1592_s4  ;;  %v336_v20 = vstv %s1602_s21  ;;  %s1825_s4 = sld [smem:[#allocation7 + $0x14]] }
 0x131   :  { %v267_v18 = vld [vmem:[#allocation2 + $0xa] sm:$0xff]  ;;  %v268_v19 = vld [vmem:[#allocation2 + $0x12] sm:$0xff]  ;;  %v240_v35 = vadd.f32 %v238_v15, %v232_v14  ;;  %v241_v36 = vadd.f32 %v239_v28, %v233_v25  ;;  %v262_v43 = vmul.f32 %v261_v30, %v259_v12  ;;  %v263_v47 = vmul.f32 %v261_v30, %v260_v17  ;;  %s1833_s21 = sld [smem:[#allocation7 + $0x22]] }
 0x132   :  { %v275_v22 = vld [vmem:[#allocation2 + $0xb] sm:$0xff]  ;;  %v276_v23 = vld [vmem:[#allocation2 + $0x13] sm:$0xff]  ;;  %v270_v50 = vmul.f32 %v269_v37, %v267_v18  ;;  %790 = vrot.lane.b32.xlu0 %v1546_v44, %s1370_s24  ;;  %v271_v56 = vmul.f32 %v269_v37, %v268_v19  ;;  %718 = vrot.lane.b32.xlu1 %v1585_v33, %s1368_s22  ;;  %v328_v15 = vstv %s1595_s5  ;;  %s1621_s22 = sld [smem:[#allocation7 + $0x3]] }
 0x133   :  { %299 = vst.msk [vmem:[#allocation2 + $0x8] sm:$0xff] %vm127_vm0, %v297_v21  ;;  %300 = vst.msk [vmem:[#allocation2 + $0x10] sm:$0xff] %vm127_vm0, %v298_v13  ;;  %v248_v34 = vadd.f32 %v246_v24, %v240_v35  ;;  %v249_v40 = vadd.f32 %v247_v31, %v241_v36  ;;  %v278_v26 = vmul.f32 %v277_v46, %v275_v22  ;;  %v344_v24 = vstv %s1605_s6  ;;  %s1829_s5 = sld [smem:[#allocation7 + $0x1b]] }
 0x134   :  { %v279_v0 = vmul.f32 %v277_v46, %v276_v23  ;;  %v422_v23 = vpop.permute.xlu0 %421  ;;  %v424_v35 = vpop.permute.xlu1 %423  ;;  %s1837_s6 = sld [smem:[#allocation7 + $0x29]] }
 0x135   :  { %v256_v38 = vadd.f32 %v254_v29, %v248_v34  ;;  %v257_v48 = vadd.f32 %v255_v41, %v249_v40  ;;  %v352_v34 = vstv %s1610_s20  ;;  %v429_v40 = vsel %vm427_vm8, %v418_v8, %v424_v35  ;;  %s1840_s20 = sld [smem:[#allocation7 + $0x30]] }
 0x136   :  { %796 = vrot.lane.b32.xlu0 %v1546_v44, %s1371_s25  ;;  %724 = vrot.lane.b32.xlu1 %v1585_v33, %s1369_s23  ;;  %s1641_s23 = sld [smem:[#allocation7 + $0x18]] }
 0x137   :  { %v264_v49 = vadd.f32 %v262_v43, %v256_v38  ;;  %v265_v55 = vadd.f32 %v263_v47, %v257_v48  ;;  %v428_v38 = vsel %vm427_vm8, %v416_v4, %v422_v23 }
 0x139   :  { %v272_v57 = vadd.f32 %v270_v50, %v264_v49  ;;  %v273_v32 = vadd.f32 %v271_v56, %v265_v55 }
 0x13a   :  { %v302_v52 = vld [vmem:[#allocation2 + $0x5] sm:$0xff]  ;;  %v303_v58 = vld [vmem:[#allocation2 + $0xd] sm:$0xff]  ;;  %922 = vrot.lane.b32.xlu0 %v1546_v44, %s1372_s26  ;;  %792 = vrot.lane.b32.xlu1 %v1585_v33, %s1370_s24  ;;  %s1646_s24 = sld [smem:[#allocation7 + $0x1f]] }
 0x13b   :  { %v310_v53 = vld [vmem:[#allocation2 + $0x6] sm:$0xff]  ;;  %v311_v59 = vld [vmem:[#allocation2 + $0xe] sm:$0xff]  ;;  %v280_v2 = vadd.f32 %v278_v26, %v272_v57  ;;  %v305_v3 = vmul.f32 %v304_v51, %v302_v52  ;;  %v281_v13 = vadd.f32 %v279_v0, %v273_v32  ;;  %v306_v14 = vmul.f32 %v304_v51, %v303_v58  ;;  %v493_v32 = vpop.permute.xlu1 %492 }
 0x13c   :  { %v318_v54 = vld [vmem:[#allocation2 + $0x7] sm:$0xff]  ;;  %v319_v61 = vld [vmem:[#allocation2 + $0xf] sm:$0xff]  ;;  %v313_v9 = vmul.f32 %v312_v60, %v310_v53  ;;  %v314_v19 = vmul.f32 %v312_v60, %v311_v59  ;;  %v362_v51 = vstv %s1621_s22  ;;  %s1842_s22 = sld [smem:[#allocation7 + $0x31]] }
 0x13d   :  { %v326_v27 = vld [vmem:[#allocation2 + $0x8] sm:$0xff]  ;;  %v327_v62 = vld [vmem:[#allocation2 + $0x10] sm:$0xff]  ;;  %v307_v1 = vadd.f32 %v305_v3, %v280_v2  ;;  %v321_v17 = vmul.f32 %v320_v10, %v318_v54  ;;  %v308_v18 = vadd.f32 %v306_v14, %v281_v13  ;;  %v322_v22 = vmul.f32 %v320_v10, %v319_v61 }
 0x13e   :  { %v334_v63 = vld [vmem:[#allocation2 + $0x9] sm:$0xff]  ;;  %v335_v5 = vld [vmem:[#allocation2 + $0x11] sm:$0xff]  ;;  %v330_v29 = vmul.f32 %v328_v15, %v327_v62  ;;  %928 = vrot.lane.b32.xlu0 %v1546_v44, %s1373_s27  ;;  %798 = vrot.lane.b32.xlu1 %v1585_v33, %s1371_s25  ;;  %v370_v61 = vstv %s1626_s7  ;;  %v430_v62 = vsel %vm124_vm9, %v428_v38, 0.0  ;;  %s1671_s25 = sld [smem:[#allocation7 + $0x2d]] }
 0x13f   :  { %v342_v6 = vld [vmem:[#allocation2 + $0xa] sm:$0xff]  ;;  %v343_v7 = vld [vmem:[#allocation2 + $0x12] sm:$0xff]  ;;  %v315_v16 = vadd.f32 %v313_v9, %v307_v1  ;;  %v316_v21 = vadd.f32 %v314_v19, %v308_v18  ;;  %v337_v30 = vmul.f32 %v336_v20, %v334_v63  ;;  %v338_v43 = vmul.f32 %v336_v20, %v335_v5  ;;  %s1844_s7 = sld [smem:[#allocation7 + $0x38]] }
 0x140   :  { %v350_v11 = vld [vmem:[#allocation2 + $0xb] sm:$0xff]  ;;  %v1612_v12 = vld [vmem:[#allocation2 + $0x13] sm:$0xff]  ;;  %v345_v47 = vmul.f32 %v344_v24, %v342_v6  ;;  %v346_v56 = vmul.f32 %v344_v24, %v343_v7  ;;  %v431_v63 = vsel %vm124_vm9, %v429_v40, 0.0  ;;  %v378_v7 = vstv %s1631_s8  ;;  %s1850_s8 = sld [smem:[#allocation7 + $0x3f]] }
 0x141   :  { %357 = vst.msk [vmem:[#allocation2 + $0x8] sm:$0xff] %vm127_vm0, %v1436_v39  ;;  %358 = vst.msk [vmem:[#allocation2 + $0x10] sm:$0xff] %vm127_vm0, %v1443_v42  ;;  %v323_v39 = vadd.f32 %v321_v17, %v315_v16  ;;  %v329_v42 = vmul.f32 %v328_v15, %v326_v27  ;;  %v324_v28 = vadd.f32 %v322_v22, %v316_v21  ;;  %v491_v27 = vpop.permute.xlu0 %490  ;;  %v499_v17 = vpop.permute.xlu1 %498  ;;  %v394_v18 = vstv %s1646_s24  ;;  %s1860_s24 = sld [smem:[#allocation7 + $0x4d]] }
 0x142   :  { %v353_v26 = vmul.f32 %v352_v34, %v350_v11  ;;  %996 = vrot.lane.b32.xlu0 %v1546_v44, %s1374_s28  ;;  %v354_v4 = vmul.f32 %v352_v34, %v1612_v12  ;;  %924 = vrot.lane.b32.xlu1 %v1585_v33, %s1372_s26  ;;  %v386_v12 = vstv %s1641_s23  ;;  %s1683_s26 = sld [smem:[#allocation7 + $0xb]]  ;;  %v402_v22 = vstv %s1661_s9 }
 0x143   :  { %v331_v25 = vadd.f32 %v329_v42, %v323_v39  ;;  %v332_v41 = vadd.f32 %v330_v29, %v324_v28  ;;  %s1856_s23 = sld [smem:[#allocation7 + $0x46]] }
 0x144   :  { %v410_v38 = vstv %s1671_s25  ;;  %s1865_s9 = sld [smem:[#allocation7 + $0x54]] }
 0x145   :  { %v339_v46 = vadd.f32 %v337_v30, %v331_v25  ;;  %v340_v55 = vadd.f32 %v338_v43, %v332_v41  ;;  %v497_v14 = vpop.permute.xlu0 %496  ;;  %v504_v25 = vsel %vm502_vm10, %v493_v32, %v499_v17  ;;  %s1868_s25 = sld [smem:[#allocation7 + $0x5b]] }
 0x146   :  { %1002 = vrot.lane.b32.xlu0 %v1546_v44, %s1375_s29  ;;  %930 = vrot.lane.b32.xlu1 %v1585_v33, %s1373_s27  ;;  %v503_v21 = vsel %vm502_vm10, %v491_v27, %v497_v14  ;;  %s1707_s27 = sld [smem:[#allocation7 + $0x12]] }
 0x147   :  { %v347_v57 = vadd.f32 %v345_v47, %v339_v46  ;;  %v348_v3 = vadd.f32 %v346_v56, %v340_v55  ;;  %v437_v56 = vstv %s1678_s10  ;;  %s1873_s10 = sld [smem:[#allocation7 + $0x32]] }
 0x148   :  { %v360_v36 = vld [vmem:[#allocation2 + $0x5] sm:$0xff]  ;;  %v361_v31 = vld [vmem:[#allocation2 + $0xd] sm:$0xff]  ;;  %v445_v32 = vstv %s1683_s26  ;;  %s1880_s26 = sld [smem:[#allocation7 + $0x39]] }
 0x149   :  { %v369_v37 = vld [vmem:[#allocation2 + $0xe] sm:$0xff]  ;;  %v368_v48 = vld [vmem:[#allocation2 + $0x6] sm:$0xff]  ;;  %v355_v5 = vadd.f32 %v353_v26, %v347_v57  ;;  %v363_v6 = vmul.f32 %v362_v51, %v360_v36  ;;  %v356_v8 = vadd.f32 %v354_v4, %v348_v3  ;;  %v364_v10 = vmul.f32 %v362_v51, %v361_v31 }
 0x14a   :  { %v376_v49 = vld [vmem:[#allocation2 + $0x7] sm:$0xff]  ;;  %v377_v50 = vld [vmem:[#allocation2 + $0xf] sm:$0xff]  ;;  %v371_v13 = vmul.f32 %v370_v61, %v368_v48  ;;  %v372_v9 = vmul.f32 %v370_v61, %v369_v37  ;;  %1070 = vrot.lane.b32.xlu0 %v1546_v44, %s1376_s30  ;;  %998 = vrot.lane.b32.xlu1 %v1585_v33, %s1374_s28  ;;  %v505_v51 = vsel %vm125_vm11, %v503_v21, 0.0  ;;  %s1733_s28 = sld [smem:[#allocation7 + $0x19]] }
 0x14b   :  { %v384_v52 = vld [vmem:[#allocation2 + $0x8] sm:$0xff]  ;;  %v1644_v53 = vld [vmem:[#allocation2 + $0x10] sm:$0xff]  ;;  %v365_v11 = vadd.f32 %v363_v6, %v355_v5  ;;  %v366_v1 = vadd.f32 %v364_v10, %v356_v8  ;;  %v379_v16 = vmul.f32 %v378_v7, %v376_v49  ;;  %v380_v20 = vmul.f32 %v378_v7, %v377_v50 }
 0x14c   :  { %v392_v54 = vld [vmem:[#allocation2 + $0x9] sm:$0xff]  ;;  %v1650_v58 = vld [vmem:[#allocation2 + $0x11] sm:$0xff]  ;;  %v387_v42 = vmul.f32 %v386_v12, %v384_v52  ;;  %v388_v37 = vmul.f32 %v386_v12, %v1644_v53  ;;  %v566_v52 = vpop.permute.xlu0 %565  ;;  %v506_v53 = vsel %vm125_vm11, %v504_v25, 0.0 }
 0x14d   :  { %v400_v59 = vld [vmem:[#allocation2 + $0xa] sm:$0xff]  ;;  %v1652_v60 = vld [vmem:[#allocation2 + $0x12] sm:$0xff]  ;;  %v373_v15 = vadd.f32 %v371_v13, %v365_v11  ;;  %v374_v19 = vadd.f32 %v372_v9, %v366_v1  ;;  %v395_v30 = vmul.f32 %v394_v18, %v392_v54  ;;  %v568_v54 = vpop.permute.xlu1 %567  ;;  %v396_v61 = vmul.f32 %v394_v18, %v1650_v58 }
 0x14e   :  { %v1663_v0 = vld [vmem:[#allocation2 + $0xb] sm:$0xff]  ;;  %v1665_v2 = vld [vmem:[#allocation2 + $0x13] sm:$0xff]  ;;  %v403_v47 = vmul.f32 %v402_v22, %v400_v59  ;;  %1076 = vrot.lane.b32.xlu0 %v1546_v44, %s1377_s3  ;;  %1004 = vrot.lane.b32.xlu1 %v1585_v33, %s1375_s29  ;;  %v404_v6 = vmul.f32 %v402_v22, %v1652_v60  ;;  %v453_v58 = vstv %s1707_s27  ;;  %s1758_s29 = sld [smem:[#allocation7 + $0x27]] }
 0x14f   :  { %432 = vst.msk [vmem:[#allocation2 + $0x8] sm:$0xff] %vm127_vm0, %v430_v62  ;;  %433 = vst.msk [vmem:[#allocation2 + $0x10] sm:$0xff] %vm127_vm0, %v431_v63  ;;  %v381_v39 = vadd.f32 %v379_v16, %v373_v15  ;;  %v382_v28 = vadd.f32 %v380_v20, %v374_v19  ;;  %v411_v59 = vmul.f32 %v410_v38, %v1663_v0  ;;  %s1884_s27 = sld [smem:[#allocation7 + $0x40]] }
 0x150   :  { %v572_v5 = vpop.permute.xlu0 %571  ;;  %v412_v16 = vmul.f32 %v410_v38, %v1665_v2 }
 0x151   :  { %v389_v29 = vadd.f32 %v387_v42, %v381_v39  ;;  %v390_v55 = vadd.f32 %v388_v37, %v382_v28  ;;  %v574_v0 = vpop.permute.xlu1 %573  ;;  %v578_v1 = vsel %vm577_vm12, %v566_v52, %v572_v5  ;;  %v461_v39 = vstv %s1733_s28  ;;  %s1887_s28 = sld [smem:[#allocation7 + $0x47]] }
 0x152   :  { %1072 = vrot.lane.b32.xlu1 %v1585_v33, %s1376_s30  ;;  %v579_v60 = vsel %vm577_vm12, %v568_v54, %v574_v0  ;;  %v580_v2 = vsel %vm126_vm13, %v578_v1, 0.0  ;;  %v469_v37 = vstv %s1739_s11  ;;  %s1779_s30 = sld [smem:[#allocation7 + $0x2e]]  ;;  %v528_v5 = vstv %s1794_s13 }
 0x153   :  { %v397_v46 = vadd.f32 %v395_v30, %v389_v29  ;;  %v398_v3 = vadd.f32 %v396_v61, %v390_v55  ;;  %s1890_s11 = sld [smem:[#allocation7 + $0x4e]] }
 0x154   :  { %v477_v52 = vstv %s1758_s29  ;;  %s1895_s29 = sld [smem:[#allocation7 + $0x55]] }
 0x155   :  { %v405_v27 = vadd.f32 %v403_v47, %v397_v46  ;;  %v406_v8 = vadd.f32 %v404_v6, %v398_v3  ;;  %s1913_s13 = sld [smem:[#allocation7 + $0x41]] }
 0x156   :  { %v435_v23 = vld [vmem:[#allocation2 + $0x5] sm:$0xff]  ;;  %v1690_v35 = vld [vmem:[#allocation2 + $0xd] sm:$0xff]  ;;  %1078 = vrot.lane.b32.xlu1 %v1585_v33, %s1377_s3  ;;  %s1784_s3 = sld [smem:[#allocation7 + $0x5]] }
 0x157   :  { %v443_v24 = vld [vmem:[#allocation2 + $0x6] sm:$0xff]  ;;  %v1693_v34 = vld [vmem:[#allocation2 + $0xe] sm:$0xff]  ;;  %v413_v62 = vadd.f32 %v411_v59, %v405_v27  ;;  %v438_v63 = vmul.f32 %v437_v56, %v435_v23  ;;  %v581_v23 = vsel %vm126_vm13, %v579_v60, 0.0  ;;  %v439_v30 = vmul.f32 %v437_v56, %v1690_v35 }
 0x158   :  { %v451_v36 = vld [vmem:[#allocation2 + $0x7] sm:$0xff]  ;;  %v1695_v31 = vld [vmem:[#allocation2 + $0xf] sm:$0xff]  ;;  %v446_v7 = vmul.f32 %v445_v32, %v443_v24  ;;  %v414_v24 = vadd.f32 %v412_v16, %v406_v8  ;;  %v447_v47 = vmul.f32 %v445_v32, %v1693_v34  ;;  %v485_v55 = vstv %s1779_s30  ;;  %s1900_s30 = sld [smem:[#allocation7 + $0x5c]] }
 0x159   :  { %v1699_v40 = vld [vmem:[#allocation2 + $0x8] sm:$0xff]  ;;  %v1701_v41 = vld [vmem:[#allocation2 + $0x10] sm:$0xff]  ;;  %v440_v4 = vadd.f32 %v438_v63, %v413_v62  ;;  %v454_v17 = vmul.f32 %v453_v58, %v451_v36  ;;  %v455_v35 = vmul.f32 %v453_v58, %v1695_v31 }
 0x15a   :  { %v1703_v43 = vld [vmem:[#allocation2 + $0x9] sm:$0xff]  ;;  %v1709_v48 = vld [vmem:[#allocation2 + $0x11] sm:$0xff]  ;;  %v462_v36 = vmul.f32 %v461_v39, %v1699_v40  ;;  %v441_v38 = vadd.f32 %v439_v30, %v414_v24  ;;  %v463_v34 = vmul.f32 %v461_v39, %v1701_v41 }
 0x15b   :  { %v1711_v49 = vld [vmem:[#allocation2 + $0xa] sm:$0xff]  ;;  %v1713_v50 = vld [vmem:[#allocation2 + $0x12] sm:$0xff]  ;;  %v448_v10 = vadd.f32 %v446_v7, %v440_v4  ;;  %v471_v31 = vmul.f32 %v469_v37, %v1709_v48  ;;  %v536_v48 = vstv %s1798_s14  ;;  %s1916_s14 = sld [smem:[#allocation7 + $0x48]] }
 0x15c   :  { %v1722_v57 = vld [vmem:[#allocation2 + $0xb] sm:$0xff]  ;;  %v1724_v26 = vld [vmem:[#allocation2 + $0x13] sm:$0xff]  ;;  %v478_v40 = vmul.f32 %v477_v52, %v1711_v49  ;;  %v512_v59 = vstv %s1784_s3  ;;  %v520_v49 = vstv %s1789_s12  ;;  %v479_v4 = vmul.f32 %v477_v52, %v1713_v50  ;;  %s1905_s3 = sld [smem:[#allocation7 + $0x33]] }
 0x15d   :  { %507 = vst.msk [vmem:[#allocation2 + $0x8] sm:$0xff] %vm127_vm0, %v505_v51  ;;  %508 = vst.msk [vmem:[#allocation2 + $0x10] sm:$0xff] %vm127_vm0, %v506_v53  ;;  %v456_v25 = vadd.f32 %v454_v17, %v448_v10  ;;  %v470_v51 = vmul.f32 %v469_v37, %v1703_v43  ;;  %v449_v53 = vadd.f32 %v447_v47, %v441_v38  ;;  %v544_v50 = vstv %s1802_s17  ;;  %s1910_s12 = sld [smem:[#allocation7 + $0x3a]] }
 0x15e   :  { %v486_v43 = vmul.f32 %v485_v55, %v1722_v57  ;;  %v487_v6 = vmul.f32 %v485_v55, %v1724_v26  ;;  %v595_v38 = vstv %s1820_s0  ;;  %v603_v52 = vstv %s1825_s4  ;;  %s1919_s17 = sld [smem:[#allocation7 + $0x4f]] }
 0x15f   :  { %v464_v46 = vadd.f32 %v462_v36, %v456_v25  ;;  %v457_v56 = vadd.f32 %v455_v35, %v449_v53  ;;  %v587_v25 = vstv %s1815_s1  ;;  %s1936_s1 = sld [smem:[#allocation7 + $0x34]] }
 0x160   :  { %s1939_s0 = sld [smem:[#allocation7 + $0x3b]] }
 0x161   :  { %v472_v54 = vadd.f32 %v470_v51, %v464_v46  ;;  %v465_v61 = vadd.f32 %v463_v34, %v457_v56  ;;  %v611_v56 = vstv %s1829_s5  ;;  %s1942_s4 = sld [smem:[#allocation7 + $0x42]] }
 0x162   :  { %s1947_s5 = sld [smem:[#allocation7 + $0x49]] }
 0x163   :  { %v480_v27 = vadd.f32 %v478_v40, %v472_v54  ;;  %v473_v32 = vadd.f32 %v471_v31, %v465_v61  ;;  %v619_v31 = vstv %s1833_s21  ;;  %s1952_s21 = sld [smem:[#allocation7 + $0x50]] }
 0x164   :  { %v510_v11 = vld [vmem:[#allocation2 + $0x5] sm:$0xff]  ;;  %v1741_v13 = vld [vmem:[#allocation2 + $0xd] sm:$0xff] }
 0x165   :  { %v518_v12 = vld [vmem:[#allocation2 + $0x6] sm:$0xff]  ;;  %v1746_v9 = vld [vmem:[#allocation2 + $0xe] sm:$0xff]  ;;  %v488_v62 = vadd.f32 %v486_v43, %v480_v27  ;;  %v513_v63 = vmul.f32 %v512_v59, %v510_v11  ;;  %v481_v57 = vadd.f32 %v479_v4, %v473_v32  ;;  %v514_v10 = vmul.f32 %v512_v59, %v1741_v13 }
 0x166   :  { %v526_v14 = vld [vmem:[#allocation2 + $0x7] sm:$0xff]  ;;  %v1748_v15 = vld [vmem:[#allocation2 + $0xf] sm:$0xff]  ;;  %v521_v41 = vmul.f32 %v520_v49, %v518_v12  ;;  %v522_v60 = vmul.f32 %v520_v49, %v1746_v9 }
 0x167   :  { %v534_v18 = vld [vmem:[#allocation2 + $0x8] sm:$0xff]  ;;  %v1751_v19 = vld [vmem:[#allocation2 + $0x10] sm:$0xff]  ;;  %v515_v3 = vadd.f32 %v513_v63, %v488_v62  ;;  %v529_v7 = vmul.f32 %v528_v5, %v526_v14  ;;  %v489_v58 = vadd.f32 %v487_v6, %v481_v57  ;;  %v552_v14 = vstv %s1806_s18  ;;  %s1922_s18 = sld [smem:[#allocation7 + $0x56]] }
 0x168   :  { %v1753_v20 = vld [vmem:[#allocation2 + $0x9] sm:$0xff]  ;;  %v1760_v42 = vld [vmem:[#allocation2 + $0x11] sm:$0xff]  ;;  %v537_v11 = vmul.f32 %v536_v48, %v534_v18  ;;  %v530_v39 = vmul.f32 %v528_v5, %v1748_v15  ;;  %v560_v18 = vstv %s1810_s19  ;;  %v538_v9 = vmul.f32 %v536_v48, %v1751_v19  ;;  %s1927_s19 = sld [smem:[#allocation7 + $0x5d]] }
 0x169   :  { %v1762_v21 = vld [vmem:[#allocation2 + $0xa] sm:$0xff]  ;;  %v1764_v22 = vld [vmem:[#allocation2 + $0x12] sm:$0xff]  ;;  %v523_v0 = vadd.f32 %v521_v41, %v515_v3  ;;  %v516_v12 = vadd.f32 %v514_v10, %v489_v58  ;;  %v545_v26 = vmul.f32 %v544_v50, %v1753_v20  ;;  %v546_v15 = vmul.f32 %v544_v50, %v1760_v42 }
 0x16a   :  { %v1770_v28 = vld [vmem:[#allocation2 + $0xb] sm:$0xff]  ;;  %v1772_v29 = vld [vmem:[#allocation2 + $0x13] sm:$0xff]  ;;  %v553_v13 = vmul.f32 %v552_v14, %v1762_v21  ;;  %v554_v19 = vmul.f32 %v552_v14, %v1764_v22 }
 0x16b   :  { %582 = vst.msk [vmem:[#allocation2 + $0x8] sm:$0xff] %vm127_vm0, %v580_v2  ;;  %583 = vst.msk [vmem:[#allocation2 + $0x10] sm:$0xff] %vm127_vm0, %v581_v23  ;;  %v531_v8 = vadd.f32 %v529_v7, %v523_v0  ;;  %v524_v16 = vadd.f32 %v522_v60, %v516_v12  ;;  %v561_v20 = vmul.f32 %v560_v18, %v1770_v28  ;;  %v627_v0 = vstv %s1837_s6  ;;  %s1963_s6 = sld [smem:[#allocation7 + $0x57]] }
 0x16c   :  { %v562_v42 = vmul.f32 %v560_v18, %v1772_v29  ;;  %v663_v60 = vstv %s1842_s22  ;;  %v679_v18 = vstv %s1850_s8  ;;  %s1977_s22 = sld [smem:[#allocation7 + $0x35]] }
 0x16d   :  { %v539_v1 = vadd.f32 %v537_v11, %v531_v8  ;;  %v532_v2 = vadd.f32 %v530_v39, %v524_v16  ;;  %v635_v11 = vstv %s1840_s20  ;;  %s1973_s20 = sld [smem:[#allocation7 + $0x5e]] }
 0x16e   :  { %s1985_s8 = sld [smem:[#allocation7 + $0x43]] }
 0x16f   :  { %v547_v17 = vadd.f32 %v545_v26, %v539_v1  ;;  %v540_v30 = vadd.f32 %v538_v9, %v532_v2  ;;  %v671_v26 = vstv %s1844_s7  ;;  %s1980_s7 = sld [smem:[#allocation7 + $0x3c]] }
 0x171   :  { %v555_v23 = vadd.f32 %v553_v13, %v547_v17  ;;  %v548_v46 = vadd.f32 %v546_v15, %v540_v30 }
 0x172   :  { %v585_v24 = vld [vmem:[#allocation2 + $0x5] sm:$0xff]  ;;  %v586_v40 = vld [vmem:[#allocation2 + $0xd] sm:$0xff] }
 0x173   :  { %v563_v36 = vadd.f32 %v561_v20, %v555_v23  ;;  %v588_v21 = vmul.f32 %v587_v25, %v585_v24  ;;  %v593_v37 = vld [vmem:[#allocation2 + $0x6] sm:$0xff]  ;;  %v556_v53 = vadd.f32 %v554_v19, %v548_v46  ;;  %v589_v22 = vmul.f32 %v587_v25, %v586_v40  ;;  %v594_v61 = vld [vmem:[#allocation2 + $0xe] sm:$0xff] }
 0x174   :  { %v596_v28 = vmul.f32 %v595_v38, %v593_v37  ;;  %v601_v51 = vld [vmem:[#allocation2 + $0x7] sm:$0xff]  ;;  %v597_v3 = vmul.f32 %v595_v38, %v594_v61  ;;  %v602_v5 = vld [vmem:[#allocation2 + $0xf] sm:$0xff] }
 0x175   :  { %v590_v47 = vadd.f32 %v588_v21, %v563_v36  ;;  %v604_v35 = vmul.f32 %v603_v52, %v601_v51  ;;  %v609_v55 = vld [vmem:[#allocation2 + $0x8] sm:$0xff]  ;;  %v564_v27 = vadd.f32 %v562_v42, %v556_v53  ;;  %v605_v58 = vmul.f32 %v603_v52, %v602_v5  ;;  %v610_v10 = vld [vmem:[#allocation2 + $0x10] sm:$0xff] }
 0x176   :  { %v612_v59 = vmul.f32 %v611_v56, %v609_v55  ;;  %v617_v62 = vld [vmem:[#allocation2 + $0x9] sm:$0xff]  ;;  %v613_v14 = vmul.f32 %v611_v56, %v610_v10  ;;  %v618_v17 = vld [vmem:[#allocation2 + $0x11] sm:$0xff]  ;;  %v687_v42 = vstv %s1856_s23  ;;  %s1990_s23 = sld [smem:[#allocation7 + $0x4a]] }
 0x177   :  { %v598_v54 = vadd.f32 %v596_v28, %v590_v47  ;;  %v591_v63 = vadd.f32 %v589_v22, %v564_v27  ;;  %v620_v4 = vmul.f32 %v619_v31, %v617_v62  ;;  %v625_v57 = vld [vmem:[#allocation2 + $0xa] sm:$0xff]  ;;  %v621_v15 = vmul.f32 %v619_v31, %v618_v17  ;;  %v626_v38 = vld [vmem:[#allocation2 + $0x12] sm:$0xff] }
 0x178   :  { %v633_v6 = vld [vmem:[#allocation2 + $0xb] sm:$0xff]  ;;  %v628_v8 = vmul.f32 %v627_v0, %v625_v57  ;;  %v634_v46 = vld [vmem:[#allocation2 + $0x13] sm:$0xff]  ;;  %v629_v53 = vmul.f32 %v627_v0, %v626_v38  ;;  %v695_v22 = vstv %s1860_s24  ;;  %s2008_s24 = sld [smem:[#allocation7 + $0x51]] }
 0x179   :  { %v606_v34 = vadd.f32 %v604_v35, %v598_v54  ;;  %v599_v7 = vadd.f32 %v597_v3, %v591_v63  ;;  %v636_v16 = vmul.f32 %v635_v11, %v633_v6 }
 0x17b   :  { %v614_v49 = vadd.f32 %v612_v59, %v606_v34  ;;  %v607_v50 = vadd.f32 %v605_v58, %v599_v7 }
 0x17d   :  { %v622_v48 = vadd.f32 %v620_v4, %v614_v49  ;;  %v615_v23 = vadd.f32 %v613_v14, %v607_v50 }
 0x17f   :  { %v630_v12 = vadd.f32 %v628_v8, %v622_v48  ;;  %v623_v19 = vadd.f32 %v621_v15, %v615_v23  ;;  %v703_v48 = vstv %s1865_s9  ;;  %s2019_s9 = sld [smem:[#allocation7 + $0x58]] }
 0x181   :  { %v638_v9 = vadd.f32 %v636_v16, %v630_v12  ;;  %v631_v40 = vadd.f32 %v629_v53, %v623_v19  ;;  %v711_v16 = vstv %s1868_s25  ;;  %s2023_s25 = sld [smem:[#allocation7 + $0x5f]] }
 0x194   :  { %v643_v43 = vpop.permute.xlu0 %642 }
 0x198   :  { %v649_v29 = vpop.permute.xlu0 %648 }
 0x199   :  { %v654_v32 = vsel %vm144_vm2, %v643_v43, %v649_v29  ;;  %v637_v43 = vmul.f32 %v635_v11, %v634_v46 }
 0x19a   :  { %v656_v41 = vsel %vm121_vm3, %v654_v32, 0.0 }
 0x19b   :  { %658 = vst.msk [vmem:[#allocation2 + $0x8] sm:$0xff] %vm127_vm0, %v656_v41  ;;  %v639_v29 = vadd.f32 %v637_v43, %v631_v40 }
 0x19c   :  { %v645_v1 = vpop.permute.xlu1 %644  ;;  %v717_v2 = vpop.permute.xlu0 %716 }
 0x1a0   :  { %v651_v30 = vpop.permute.xlu1 %650  ;;  %v723_v52 = vpop.permute.xlu0 %722 }
 0x1a1   :  { %v655_v36 = vsel %vm144_vm2, %v645_v1, %v651_v30  ;;  %v728_v27 = vsel %vm219_vm4, %v717_v2, %v723_v52  ;;  %v737_v2 = vstv %s1873_s10  ;;  %v753_v52 = vstv %s1884_s27  ;;  %s2027_s10 = sld [smem:[#allocation7 + $0x36]] }
 0x1a2   :  { %v661_v39 = vld [vmem:[#allocation2 + $0x5] sm:$0xff]  ;;  %v657_v37 = vsel %vm121_vm3, %v655_v36, 0.0  ;;  %v730_v5 = vsel %vm122_vm5, %v728_v27, 0.0  ;;  %v745_v36 = vstv %s1880_s26  ;;  %s2032_s26 = sld [smem:[#allocation7 + $0x3d]] }
 0x1a3   :  { %v669_v13 = vld [vmem:[#allocation2 + $0x6] sm:$0xff]  ;;  %v664_v20 = vmul.f32 %v663_v60, %v661_v39  ;;  %659 = vst.msk [vmem:[#allocation2 + $0x10] sm:$0xff] %vm127_vm0, %v657_v37  ;;  %s2035_s27 = sld [smem:[#allocation7 + $0x44]] }
 0x1a4   :  { %v672_v24 = vmul.f32 %v671_v26, %v669_v13  ;;  %v677_v25 = vld [vmem:[#allocation2 + $0x7] sm:$0xff]  ;;  %v719_v51 = vpop.permute.xlu1 %718  ;;  %v791_v63 = vpop.permute.xlu0 %790 }
 0x1a5   :  { %v666_v21 = vadd.f32 %v664_v20, %v638_v9  ;;  %v680_v47 = vmul.f32 %v679_v18, %v677_v25  ;;  %v685_v54 = vld [vmem:[#allocation2 + $0x8] sm:$0xff] }
 0x1a6   :  { %v688_v56 = vmul.f32 %v687_v42, %v685_v54 }
 0x1a7   :  { %v674_v28 = vadd.f32 %v672_v24, %v666_v21  ;;  %v1017_v45 = vstv %s2027_s10 }
 0x1a8   :  { %v725_v55 = vpop.permute.xlu1 %724  ;;  %v797_v17 = vpop.permute.xlu0 %796 }
 0x1a9   :  { %v682_v35 = vadd.f32 %v680_v47, %v674_v28  ;;  %v729_v34 = vsel %vm219_vm4, %v719_v51, %v725_v55 }
 0x1aa   :  { %v662_v59 = vld [vmem:[#allocation2 + $0xd] sm:$0xff]  ;;  %v731_v49 = vsel %vm122_vm5, %v729_v34, 0.0 }
 0x1ab   :  { %v670_v61 = vld [vmem:[#allocation2 + $0xe] sm:$0xff]  ;;  %v690_v31 = vadd.f32 %v688_v56, %v682_v35  ;;  %v665_v32 = vmul.f32 %v663_v60, %v662_v59  ;;  %v761_v59 = vstv %s1887_s28  ;;  %s2046_s28 = sld [smem:[#allocation7 + $0x4b]] }
 0x1ac   :  { %v678_v62 = vld [vmem:[#allocation2 + $0xf] sm:$0xff]  ;;  %v793_v57 = vpop.permute.xlu1 %792  ;;  %v673_v10 = vmul.f32 %v671_v26, %v670_v61 }
 0x1ad   :  { %v686_v3 = vld [vmem:[#allocation2 + $0x10] sm:$0xff]  ;;  %v667_v8 = vadd.f32 %v665_v32, %v639_v29  ;;  %v681_v1 = vmul.f32 %v679_v18, %v678_v62  ;;  %v802_v18 = vsel %vm294_vm6, %v791_v63, %v797_v17  ;;  %v769_v32 = vstv %s1890_s11  ;;  %s2055_s11 = sld [smem:[#allocation7 + $0x52]] }
 0x1ae   :  { %v693_v4 = vld [vmem:[#allocation2 + $0x9] sm:$0xff]  ;;  %v694_v41 = vld [vmem:[#allocation2 + $0x11] sm:$0xff]  ;;  %v689_v26 = vmul.f32 %v687_v42, %v686_v3 }
 0x1af   :  { %v696_v0 = vmul.f32 %v695_v22, %v693_v4  ;;  %v701_v6 = vld [vmem:[#allocation2 + $0xa] sm:$0xff]  ;;  %v702_v7 = vld [vmem:[#allocation2 + $0x12] sm:$0xff]  ;;  %v675_v12 = vadd.f32 %v673_v10, %v667_v8  ;;  %v697_v20 = vmul.f32 %v695_v22, %v694_v41  ;;  %v804_v22 = vsel %vm123_vm7, %v802_v18, 0.0 }
 0x1b0   :  { %v709_v58 = vld [vmem:[#allocation2 + $0xb] sm:$0xff]  ;;  %v710_v11 = vld [vmem:[#allocation2 + $0x13] sm:$0xff]  ;;  %v704_v60 = vmul.f32 %v703_v48, %v701_v6  ;;  %v799_v14 = vpop.permute.xlu1 %798  ;;  %v705_v37 = vmul.f32 %v703_v48, %v702_v7 }
 0x1b1   :  { %732 = vst.msk [vmem:[#allocation2 + $0x8] sm:$0xff] %vm127_vm0, %v730_v5  ;;  %v698_v50 = vadd.f32 %v696_v0, %v690_v31  ;;  %733 = vst.msk [vmem:[#allocation2 + $0x10] sm:$0xff] %vm127_vm0, %v731_v49  ;;  %v683_v39 = vadd.f32 %v681_v1, %v675_v12  ;;  %v803_v23 = vsel %vm294_vm6, %v793_v57, %v799_v14  ;;  %v777_v57 = vstv %s1895_s29  ;;  %s2060_s29 = sld [smem:[#allocation7 + $0x59]] }
 0x1b2   :  { %v712_v24 = vmul.f32 %v711_v16, %v709_v58  ;;  %v805_v51 = vsel %vm123_vm7, %v803_v23, 0.0  ;;  %v713_v40 = vmul.f32 %v711_v16, %v710_v11  ;;  %v785_v58 = vstv %s1900_s30  ;;  %s2064_s30 = sld [smem:[#allocation7 + $0x60]] }
 0x1b3   :  { %v706_v13 = vadd.f32 %v704_v60, %v698_v50  ;;  %v691_v9 = vadd.f32 %v689_v26, %v683_v39  ;;  %v811_v60 = vstv %s1905_s3  ;;  %s2068_s3 = sld [smem:[#allocation7 + $0x37]] }
 0x1b5   :  { %v699_v21 = vadd.f32 %v697_v20, %v691_v9  ;;  %v714_v38 = vadd.f32 %v712_v24, %v706_v13  ;;  %v819_v9 = vstv %s1910_s12  ;;  %s2071_s12 = sld [smem:[#allocation7 + $0x3e]] }
 0x1b7   :  { %v707_v35 = vadd.f32 %v705_v37, %v699_v21 }
 0x1b8   :  { %v735_v25 = vld [vmem:[#allocation2 + $0x5] sm:$0xff]  ;;  %v736_v46 = vld [vmem:[#allocation2 + $0xd] sm:$0xff] }
 0x1b9   :  { %v743_v30 = vld [vmem:[#allocation2 + $0x6] sm:$0xff]  ;;  %v738_v47 = vmul.f32 %v737_v2, %v735_v25  ;;  %v744_v19 = vld [vmem:[#allocation2 + $0xe] sm:$0xff]  ;;  %v715_v31 = vadd.f32 %v713_v40, %v707_v35  ;;  %v739_v63 = vmul.f32 %v737_v2, %v736_v46  ;;  %v923_v25 = vpop.permute.xlu0 %922  ;;  %v835_v35 = vstv %s1916_s14  ;;  %s2077_s14 = sld [smem:[#allocation7 + $0x4c]] }
 0x1ba   :  { %v751_v15 = vld [vmem:[#allocation2 + $0x7] sm:$0xff]  ;;  %v752_v28 = vld [vmem:[#allocation2 + $0xf] sm:$0xff]  ;;  %v746_v56 = vmul.f32 %v745_v36, %v743_v30  ;;  %v747_v4 = vmul.f32 %v745_v36, %v744_v19  ;;  %v925_v30 = vpop.permute.xlu1 %924  ;;  %v827_v19 = vstv %s1913_s13  ;;  %s2074_s13 = sld [smem:[#allocation7 + $0x45]] }
 0x1bb   :  { %v759_v53 = vld [vmem:[#allocation2 + $0x8] sm:$0xff]  ;;  %v760_v54 = vld [vmem:[#allocation2 + $0x10] sm:$0xff]  ;;  %v740_v55 = vadd.f32 %v738_v47, %v714_v38  ;;  %v754_v29 = vmul.f32 %v753_v52, %v751_v15  ;;  %v741_v3 = vadd.f32 %v739_v63, %v715_v31  ;;  %v755_v6 = vmul.f32 %v753_v52, %v752_v28 }
 0x1bc   :  { %v767_v42 = vld [vmem:[#allocation2 + $0x9] sm:$0xff]  ;;  %v768_v27 = vld [vmem:[#allocation2 + $0x11] sm:$0xff]  ;;  %v762_v5 = vmul.f32 %v761_v59, %v759_v53  ;;  %v763_v10 = vmul.f32 %v761_v59, %v760_v54  ;;  %v851_v31 = vstv %s1922_s18  ;;  %s2083_s18 = sld [smem:[#allocation7 + $0x5a]] }
 0x1bd   :  { %v775_v34 = vld [vmem:[#allocation2 + $0xa] sm:$0xff]  ;;  %v776_v43 = vld [vmem:[#allocation2 + $0x12] sm:$0xff]  ;;  %v748_v49 = vadd.f32 %v746_v56, %v740_v55  ;;  %v749_v0 = vadd.f32 %v747_v4, %v741_v3  ;;  %v770_v48 = vmul.f32 %v769_v32, %v767_v42  ;;  %v771_v17 = vmul.f32 %v769_v32, %v768_v27 }
 0x1be   :  { %v783_v61 = vld [vmem:[#allocation2 + $0xb] sm:$0xff]  ;;  %v784_v62 = vld [vmem:[#allocation2 + $0x13] sm:$0xff]  ;;  %v778_v50 = vmul.f32 %v777_v57, %v775_v34  ;;  %v779_v15 = vmul.f32 %v777_v57, %v776_v43  ;;  %v843_v34 = vstv %s1919_s17  ;;  %v929_v43 = vpop.permute.xlu0 %928  ;;  %v859_v4 = vstv %s1927_s19  ;;  %s2080_s17 = sld [smem:[#allocation7 + $0x53]] }
 0x1bf   :  { %806 = vst.msk [vmem:[#allocation2 + $0x8] sm:$0xff] %vm127_vm0, %v804_v22  ;;  %807 = vst.msk [vmem:[#allocation2 + $0x10] sm:$0xff] %vm127_vm0, %v805_v51  ;;  %v756_v41 = vadd.f32 %v754_v29, %v748_v49  ;;  %v757_v8 = vadd.f32 %v755_v6, %v749_v0  ;;  %v786_v26 = vmul.f32 %v785_v58, %v783_v61  ;;  %v931_v22 = vpop.permute.xlu1 %930  ;;  %s2087_s19 = sld [smem:[#allocation7 + $0x61]] }
 0x1c0   :  { %v787_v53 = vmul.f32 %v785_v58, %v784_v62  ;;  %v934_v32 = vsel %vm427_vm8, %v923_v25, %v929_v43  ;;  %v935_v3 = vsel %vm427_vm8, %v925_v30, %v931_v22 }
 0x1c1   :  { %v764_v7 = vadd.f32 %v762_v5, %v756_v41  ;;  %v765_v16 = vadd.f32 %v763_v10, %v757_v8 }
 0x1c3   :  { %v772_v11 = vadd.f32 %v770_v48, %v764_v7  ;;  %v773_v36 = vadd.f32 %v771_v17, %v765_v16 }
 0x1c5   :  { %v780_v39 = vadd.f32 %v778_v50, %v772_v11  ;;  %v781_v52 = vadd.f32 %v779_v15, %v773_v36  ;;  %v869_v11 = vstv %s1936_s1  ;;  %s1378_s1 = smov [#allocation8]  }
 0x1c6   :  { %v809_v12 = vld [vmem:[#allocation2 + $0x5] sm:$0xff]  ;;  %v810_v1 = vld [vmem:[#allocation2 + $0xd] sm:$0xff] }
 0x1c7   :  { %v817_v14 = vld [vmem:[#allocation2 + $0x6] sm:$0xff]  ;;  %v818_v13 = vld [vmem:[#allocation2 + $0xe] sm:$0xff]  ;;  %v788_v21 = vadd.f32 %v786_v26, %v780_v39  ;;  %v812_v37 = vmul.f32 %v811_v60, %v809_v12  ;;  %v789_v40 = vadd.f32 %v787_v53, %v781_v52  ;;  %v813_v55 = vmul.f32 %v811_v60, %v810_v1  ;;  %v997_v60 = vpop.permute.xlu0 %996 }
 0x1c8   :  { %v825_v2 = vld [vmem:[#allocation2 + $0x7] sm:$0xff]  ;;  %v826_v23 = vld [vmem:[#allocation2 + $0xf] sm:$0xff]  ;;  %v820_v42 = vmul.f32 %v819_v9, %v817_v14  ;;  %v821_v61 = vmul.f32 %v819_v9, %v818_v13  ;;  %v999_v14 = vpop.permute.xlu1 %998  ;;  %v936_v9 = vsel %vm124_vm9, %v934_v32, 0.0  ;;  %v893_v52 = vstv %s1947_s5 }
 0x1c9   :  { %v833_v20 = vld [vmem:[#allocation2 + $0x8] sm:$0xff]  ;;  %v834_v24 = vld [vmem:[#allocation2 + $0x10] sm:$0xff]  ;;  %v814_v54 = vadd.f32 %v812_v37, %v788_v21  ;;  %v828_v27 = vmul.f32 %v827_v19, %v825_v2  ;;  %v815_v59 = vadd.f32 %v813_v55, %v789_v40  ;;  %v829_v63 = vmul.f32 %v827_v19, %v826_v23 }
 0x1ca   :  { %v841_v18 = vld [vmem:[#allocation2 + $0x9] sm:$0xff]  ;;  %v842_v38 = vld [vmem:[#allocation2 + $0x11] sm:$0xff]  ;;  %v836_v62 = vmul.f32 %v835_v35, %v833_v20  ;;  %v837_v6 = vmul.f32 %v835_v35, %v834_v24  ;;  %v937_v20 = vsel %vm124_vm9, %v935_v3, 0.0  ;;  %v877_v24 = vstv %s1939_s0  ;;  %s1163_s0 = sshll.u32 %s1378_s1, 4  ;;  %s1164_s0 = int_to_ptr.vmem [resolvable:$true] %s1163_s0 }
 0x1cb   :  { %v849_v46 = vld [vmem:[#allocation2 + $0xa] sm:$0xff]  ;;  %v1924_v47 = vld [vmem:[#allocation2 + $0x12] sm:$0xff]  ;;  %v822_v56 = vadd.f32 %v820_v42, %v814_v54  ;;  %v844_v29 = vmul.f32 %v843_v34, %v841_v18  ;;  %v845_v17 = vmul.f32 %v843_v34, %v842_v38  ;;  %v885_v37 = vstv %s1942_s4  ;;  %s1334_s4 = scalar_lea.vmem %s1164_s0, 256  ;;  %p1339_p11 = scmp.lt.s32.totalorder %s1164_s0, %s1164_s0 }
 0x1cc   :  { %v857_v28 = vld [vmem:[#allocation2 + $0xb] sm:$0xff]  ;;  %v1929_v51 = vld [vmem:[#allocation2 + $0x13] sm:$0xff]  ;;  %v852_v48 = vmul.f32 %v851_v31, %v849_v46  ;;  %v853_v36 = vmul.f32 %v851_v31, %v1924_v47  ;;  %v1003_v47 = vpop.permute.xlu0 %1002  ;;  %v1005_v53 = vpop.permute.xlu1 %1004  ;;  %v901_v55 = vstv %s1952_s21  ;;  %p1335_p10 = scmp.ne.s32.totalorder %s1164_s0, %s1334_s4  ;;  %p1340_p12 = scmp.lt.s32.totalorder %s1334_s4, %s1334_s4 }
 0x1cd   :  { %864 = vst.msk [vmem:[#allocation2 + $0x8] sm:$0xff] %vm127_vm0, %v1546_v44  ;;  %865 = vst.msk [vmem:[#allocation2 + $0x10] sm:$0xff] %vm127_vm0, %v1585_v33  ;;  %v830_v44 = vadd.f32 %v828_v27, %v822_v56  ;;  %v823_v33 = vadd.f32 %v821_v61, %v815_v59  ;;  %v860_v26 = vmul.f32 %v859_v4, %v857_v28  ;;  %v909_v59 = vstv %s1963_s6 }
 0x1ce   :  { %v861_v46 = vmul.f32 %v859_v4, %v1929_v51  ;;  %v1008_v43 = vsel %vm502_vm10, %v997_v60, %v1003_v47  ;;  %v1009_v22 = vsel %vm502_vm10, %v999_v14, %v1005_v53  ;;  %v917_v4 = vstv %s1973_s20  ;;  %p1341_p13 = por %p1340_p12, %p1339_p11 }
 0x1cf   :  { %v838_v49 = vadd.f32 %v836_v62, %v830_v44  ;;  %v831_v0 = vadd.f32 %v829_v63, %v823_v33  ;;  %v1011_v60 = vsel %vm125_vm11, %v1009_v22, 0.0  ;;  %v943_v14 = vstv %s1977_s22 }
 0x1d0   :  { %p1342_p0 = pnand %p1341_p13, %p1335_p10 }
 0x1d1   :  { %v846_v7 = vadd.f32 %v844_v29, %v838_v49  ;;  %v839_v16 = vadd.f32 %v837_v6, %v831_v0  ;;  %v1071_v0 = vpop.permute.xlu0 %1070  ;;  %v1073_v6 = vpop.permute.xlu1 %1072 }
 0x1d3   :  { %v854_v39 = vadd.f32 %v852_v48, %v846_v7  ;;  %v847_v30 = vadd.f32 %v845_v17, %v839_v16 }
 0x1d4   :  { %v867_v41 = vld [vmem:[#allocation2 + $0x5] sm:$0xff]  ;;  %v868_v5 = vld [vmem:[#allocation2 + $0xd] sm:$0xff] }
 0x1d5   :  { %v875_v57 = vld [vmem:[#allocation2 + $0x6] sm:$0xff]  ;;  %v876_v58 = vld [vmem:[#allocation2 + $0xe] sm:$0xff]  ;;  %v862_v15 = vadd.f32 %v860_v26, %v854_v39  ;;  %v870_v21 = vmul.f32 %v869_v11, %v867_v41  ;;  %v855_v38 = vadd.f32 %v853_v36, %v847_v30  ;;  %v871_v42 = vmul.f32 %v869_v11, %v868_v5 }
 0x1d6   :  { %v883_v8 = vld [vmem:[#allocation2 + $0x7] sm:$0xff]  ;;  %v884_v10 = vld [vmem:[#allocation2 + $0xf] sm:$0xff]  ;;  %v878_v28 = vmul.f32 %v877_v24, %v875_v57  ;;  %v879_v27 = vmul.f32 %v877_v24, %v876_v58 }
 0x1d7   :  { %v891_v50 = vld [vmem:[#allocation2 + $0x8] sm:$0xff]  ;;  %v1950_v12 = vld [vmem:[#allocation2 + $0x10] sm:$0xff]  ;;  %v872_v19 = vadd.f32 %v870_v21, %v862_v15  ;;  %v863_v54 = vadd.f32 %v861_v46, %v855_v38  ;;  %v886_v40 = vmul.f32 %v885_v37, %v883_v8  ;;  %v887_v33 = vmul.f32 %v885_v37, %v884_v10  ;;  %v1079_v21 = vpop.permute.xlu1 %1078 }
 0x1d8   :  { %v899_v1 = vld [vmem:[#allocation2 + $0x9] sm:$0xff]  ;;  %v1954_v13 = vld [vmem:[#allocation2 + $0x11] sm:$0xff]  ;;  %v894_v51 = vmul.f32 %v893_v52, %v891_v50  ;;  %v895_v48 = vmul.f32 %v893_v52, %v1950_v12  ;;  %v959_v15 = vstv %s1985_s8 }
 0x1d9   :  { %v907_v2 = vld [vmem:[#allocation2 + $0xa] sm:$0xff]  ;;  %v1956_v23 = vld [vmem:[#allocation2 + $0x12] sm:$0xff]  ;;  %v880_v35 = vadd.f32 %v878_v28, %v872_v19  ;;  %v873_v56 = vadd.f32 %v871_v42, %v863_v54  ;;  %v902_v49 = vmul.f32 %v901_v55, %v899_v1  ;;  %v1010_v1 = vsel %vm125_vm11, %v1008_v43, 0.0 }
 0x1da   :  { %v1965_v18 = vld [vmem:[#allocation2 + $0xb] sm:$0xff]  ;;  %v1967_v25 = vld [vmem:[#allocation2 + $0x13] sm:$0xff]  ;;  %v910_v8 = vmul.f32 %v909_v59, %v907_v2  ;;  %v903_v39 = vmul.f32 %v901_v55, %v1954_v13  ;;  %v911_v24 = vmul.f32 %v909_v59, %v1956_v23  ;;  %v1077_v13 = vpop.permute.xlu0 %1076  ;;  %v967_v19 = vstv %s1990_s23 }
 0x1db   :  { %938 = vst.msk [vmem:[#allocation2 + $0x8] sm:$0xff] %vm127_vm0, %v936_v9  ;;  %939 = vst.msk [vmem:[#allocation2 + $0x10] sm:$0xff] %vm127_vm0, %v937_v20  ;;  %v888_v34 = vadd.f32 %v886_v40, %v880_v35  ;;  %v881_v31 = vadd.f32 %v879_v27, %v873_v56  ;;  %v918_v2 = vmul.f32 %v917_v4, %v1965_v18  ;;  %v951_v9 = vstv %s1980_s7 }
 0x1dc   :  { %v919_v37 = vmul.f32 %v917_v4, %v1967_v25  ;;  %v1082_v53 = vsel %vm577_vm12, %v1071_v0, %v1077_v13  ;;  %v1083_v54 = vsel %vm577_vm12, %v1073_v6, %v1079_v21  ;;  %v975_v42 = vstv %s2008_s24 }
 0x1dd   :  { %v896_v63 = vadd.f32 %v894_v51, %v888_v34  ;;  %v889_v7 = vadd.f32 %v887_v33, %v881_v31  ;;  %v983_v59 = vstv %s2019_s9  ;;  %v1085_v0 = vsel %vm126_vm13, %v1083_v54, 0.0 }
 0x1de   :  { %v991_v6 = vstv %s2023_s25 }
 0x1df   :  { %v904_v58 = vadd.f32 %v902_v49, %v896_v63  ;;  %v897_v17 = vadd.f32 %v895_v48, %v889_v7 }
 0x1e1   :  { %v912_v26 = vadd.f32 %v910_v8, %v904_v58  ;;  %v905_v20 = vadd.f32 %v903_v39, %v897_v17  ;;  %v1025_v39 = vstv %s2032_s26 }
 0x1e2   :  { %v941_v61 = vld [vmem:[#allocation2 + $0x5] sm:$0xff]  ;;  %v942_v44 = vld [vmem:[#allocation2 + $0xd] sm:$0xff] }
 0x1e3   :  { %v949_v62 = vld [vmem:[#allocation2 + $0x6] sm:$0xff]  ;;  %v950_v29 = vld [vmem:[#allocation2 + $0xe] sm:$0xff]  ;;  %v920_v30 = vadd.f32 %v918_v2, %v912_v26  ;;  %v944_v36 = vmul.f32 %v943_v14, %v941_v61  ;;  %v913_v18 = vadd.f32 %v911_v24, %v905_v20  ;;  %v945_v52 = vmul.f32 %v943_v14, %v942_v44 }
 0x1e4   :  { %v957_v32 = vld [vmem:[#allocation2 + $0x7] sm:$0xff]  ;;  %v1987_v3 = vld [vmem:[#allocation2 + $0xf] sm:$0xff]  ;;  %v952_v46 = vmul.f32 %v951_v9, %v949_v62  ;;  %v953_v56 = vmul.f32 %v951_v9, %v950_v29  ;;  %v1033_v9 = vstv %s2035_s27 }
 0x1e5   :  { %v965_v41 = vld [vmem:[#allocation2 + $0x8] sm:$0xff]  ;;  %v1992_v5 = vld [vmem:[#allocation2 + $0x10] sm:$0xff]  ;;  %v946_v38 = vadd.f32 %v944_v36, %v920_v30  ;;  %v921_v28 = vadd.f32 %v919_v37, %v913_v18  ;;  %v960_v23 = vmul.f32 %v959_v15, %v957_v32  ;;  %v961_v33 = vmul.f32 %v959_v15, %v1987_v3 }
 0x1e6   :  { %v1994_v57 = vld [vmem:[#allocation2 + $0x9] sm:$0xff]  ;;  %v1997_v10 = vld [vmem:[#allocation2 + $0x11] sm:$0xff]  ;;  %v968_v34 = vmul.f32 %v967_v19, %v965_v41  ;;  %v1084_v41 = vsel %vm126_vm13, %v1082_v53, 0.0  ;;  %v1041_v36 = vstv %s2046_s28 }
 0x1e7   :  { %v1999_v11 = vld [vmem:[#allocation2 + $0xa] sm:$0xff]  ;;  %v2001_v50 = vld [vmem:[#allocation2 + $0x12] sm:$0xff]  ;;  %v954_v47 = vadd.f32 %v952_v46, %v946_v38  ;;  %v947_v55 = vadd.f32 %v945_v52, %v921_v28  ;;  %v976_v49 = vmul.f32 %v975_v42, %v1994_v57  ;;  %v969_v57 = vmul.f32 %v967_v19, %v1992_v5 }
 0x1e8   :  { %v2010_v12 = vld [vmem:[#allocation2 + $0xb] sm:$0xff]  ;;  %v2012_v16 = vld [vmem:[#allocation2 + $0x13] sm:$0xff]  ;;  %v984_v8 = vmul.f32 %v983_v59, %v1999_v11  ;;  %v985_v11 = vmul.f32 %v983_v59, %v2001_v50  ;;  %v1049_v50 = vstv %s2055_s11  ;;  %v1057_v19 = vstv %s2060_s29 }
 0x1e9   :  { %1012 = vst.msk [vmem:[#allocation2 + $0x8] sm:$0xff] %vm127_vm0, %v1010_v1  ;;  %1013 = vst.msk [vmem:[#allocation2 + $0x10] sm:$0xff] %vm127_vm0, %v1011_v60  ;;  %v962_v27 = vadd.f32 %v960_v23, %v954_v47  ;;  %v955_v31 = vadd.f32 %v953_v56, %v947_v55  ;;  %v977_v60 = vmul.f32 %v975_v42, %v1997_v10  ;;  %v1065_v23 = vstv %s2064_s30 }
 0x1ea   :  { %v992_v17 = vmul.f32 %v991_v6, %v2010_v12  ;;  %v993_v24 = vmul.f32 %v991_v6, %v2012_v16  ;;  %v1115_v6 = vstv %s2077_s14 }
 0x1eb   :  { %v970_v63 = vadd.f32 %v968_v34, %v962_v27  ;;  %v963_v48 = vadd.f32 %v961_v33, %v955_v31  ;;  %v1107_v33 = vstv %s2074_s13 }
 0x1ed   :  { %v978_v58 = vadd.f32 %v976_v49, %v970_v63  ;;  %v971_v1 = vadd.f32 %v969_v57, %v963_v48 }
 0x1ef   :  { %v986_v14 = vadd.f32 %v984_v8, %v978_v58  ;;  %v979_v5 = vadd.f32 %v977_v60, %v971_v1 }
 0x1f0   :  { %v1015_v35 = vld [vmem:[#allocation2 + $0x5] sm:$0xff]  ;;  %v1016_v40 = vld [vmem:[#allocation2 + $0xd] sm:$0xff] }
 0x1f1   :  { %v1023_v25 = vld [vmem:[#allocation2 + $0x6] sm:$0xff]  ;;  %v1024_v51 = vld [vmem:[#allocation2 + $0xe] sm:$0xff]  ;;  %v994_v26 = vadd.f32 %v992_v17, %v986_v14  ;;  %v1018_v2 = vmul.f32 %v1017_v45, %v1015_v35  ;;  %v987_v20 = vadd.f32 %v985_v11, %v979_v5  ;;  %v1019_v15 = vmul.f32 %v1017_v45, %v1016_v40 }
 0x1f2   :  { %v1031_v43 = vld [vmem:[#allocation2 + $0x7] sm:$0xff]  ;;  %v1032_v22 = vld [vmem:[#allocation2 + $0xf] sm:$0xff]  ;;  %v1026_v30 = vmul.f32 %v1025_v39, %v1023_v25  ;;  %v1027_v37 = vmul.f32 %v1025_v39, %v1024_v51  ;;  %v1091_v25 = vstv %s2068_s3  ;;  %v1123_v45 = vstv %s2080_s17 }
 0x1f3   :  { %v1039_v61 = vld [vmem:[#allocation2 + $0x8] sm:$0xff]  ;;  %v1040_v44 = vld [vmem:[#allocation2 + $0x10] sm:$0xff]  ;;  %v1020_v10 = vadd.f32 %v1018_v2, %v994_v26  ;;  %v995_v12 = vadd.f32 %v993_v24, %v987_v20  ;;  %v1034_v21 = vmul.f32 %v1033_v9, %v1031_v43  ;;  %v1035_v28 = vmul.f32 %v1033_v9, %v1032_v22 }
 0x1f4   :  { %v1047_v62 = vld [vmem:[#allocation2 + $0x9] sm:$0xff]  ;;  %v1048_v29 = vld [vmem:[#allocation2 + $0x11] sm:$0xff]  ;;  %v1042_v46 = vmul.f32 %v1041_v36, %v1039_v61  ;;  %v1043_v54 = vmul.f32 %v1041_v36, %v1040_v44  ;;  %v1099_v43 = vstv %s2071_s12  ;;  %v1131_v5 = vstv %s2083_s18 }
 0x1f5   :  { %v1055_v32 = vld [vmem:[#allocation2 + $0xa] sm:$0xff]  ;;  %v2039_v4 = vld [vmem:[#allocation2 + $0x12] sm:$0xff]  ;;  %v1028_v13 = vadd.f32 %v1026_v30, %v1020_v10  ;;  %v1021_v18 = vadd.f32 %v1019_v15, %v995_v12  ;;  %v1050_v47 = vmul.f32 %v1049_v50, %v1047_v62  ;;  %v1051_v56 = vmul.f32 %v1049_v50, %v1048_v29 }
 0x1f6   :  { %v1063_v7 = vld [vmem:[#allocation2 + $0xb] sm:$0xff]  ;;  %v2048_v3 = vld [vmem:[#allocation2 + $0x13] sm:$0xff]  ;;  %v1058_v35 = vmul.f32 %v1057_v19, %v1055_v32  ;;  %v1059_v59 = vmul.f32 %v1057_v19, %v2039_v4  ;;  %v1139_v10 = vstv %s2087_s19 }
 0x1f7   :  { %1086 = vst.msk [vmem:[#allocation2 + $0x8] sm:$0xff] %vm127_vm0, %v1084_v41  ;;  %1087 = vst.msk [vmem:[#allocation2 + $0x10] sm:$0xff] %vm127_vm0, %v1085_v0  ;;  %v1036_v38 = vadd.f32 %v1034_v21, %v1028_v13  ;;  %v1029_v16 = vadd.f32 %v1027_v37, %v1021_v18  ;;  %v1066_v34 = vmul.f32 %v1065_v23, %v1063_v7 }
 0x1f8   :  { %v1067_v49 = vmul.f32 %v1065_v23, %v2048_v3 }
 0x1f9   :  { %v1044_v52 = vadd.f32 %v1042_v46, %v1036_v38  ;;  %v1037_v53 = vadd.f32 %v1035_v28, %v1029_v16 }
 0x1fb   :  { %v1052_v42 = vadd.f32 %v1050_v47, %v1044_v52  ;;  %v1045_v55 = vadd.f32 %v1043_v54, %v1037_v53 }
 0x1fd   :  { %v1060_v27 = vadd.f32 %v1058_v35, %v1052_v42  ;;  %v1053_v22 = vadd.f32 %v1051_v56, %v1045_v55 }
 0x1fe   :  { %v1089_v40 = vld [vmem:[#allocation2 + $0x5] sm:$0xff]  ;;  %v1090_v62 = vld [vmem:[#allocation2 + $0xd] sm:$0xff] }
 0x1ff   :  { %v1097_v51 = vld [vmem:[#allocation2 + $0x6] sm:$0xff]  ;;  %v1068_v61 = vadd.f32 %v1066_v34, %v1060_v27  ;;  %v1092_v44 = vmul.f32 %v1091_v25, %v1089_v40  ;;  %v1061_v63 = vadd.f32 %v1059_v59, %v1053_v22  ;;  %v1098_v41 = vld [vmem:[#allocation2 + $0xe] sm:$0xff]  ;;  %v1093_v48 = vmul.f32 %v1091_v25, %v1090_v62 }
 0x200   :  { %v1105_v31 = vld [vmem:[#allocation2 + $0x7] sm:$0xff]  ;;  %v1100_v32 = vmul.f32 %v1099_v43, %v1097_v51  ;;  %v1106_v58 = vld [vmem:[#allocation2 + $0xf] sm:$0xff]  ;;  %v1101_v60 = vmul.f32 %v1099_v43, %v1098_v41 }
 0x201   :  { %v1094_v29 = vadd.f32 %v1092_v44, %v1068_v61  ;;  %v1113_v0 = vld [vmem:[#allocation2 + $0x8] sm:$0xff]  ;;  %v1069_v7 = vadd.f32 %v1067_v49, %v1061_v63  ;;  %v1108_v57 = vmul.f32 %v1107_v33, %v1105_v31  ;;  %v1114_v39 = vld [vmem:[#allocation2 + $0x10] sm:$0xff]  ;;  %v1109_v26 = vmul.f32 %v1107_v33, %v1106_v58 }
 0x202   :  { %v1121_v8 = vld [vmem:[#allocation2 + $0x9] sm:$0xff]  ;;  %v1116_v17 = vmul.f32 %v1115_v6, %v1113_v0  ;;  %v1122_v20 = vld [vmem:[#allocation2 + $0x11] sm:$0xff]  ;;  %v1117_v36 = vmul.f32 %v1115_v6, %v1114_v39 }
 0x203   :  { %v1102_v4 = vadd.f32 %v1100_v32, %v1094_v29  ;;  %v1095_v1 = vadd.f32 %v1093_v48, %v1069_v7  ;;  %v1129_v3 = vld [vmem:[#allocation2 + $0xa] sm:$0xff]  ;;  %v1124_v9 = vmul.f32 %v1123_v45, %v1121_v8  ;;  %v1130_v13 = vld [vmem:[#allocation2 + $0x12] sm:$0xff]  ;;  %v1125_v50 = vmul.f32 %v1123_v45, %v1122_v20 }
 0x204   :  { %v1137_v24 = vld [vmem:[#allocation2 + $0xb] sm:$0xff]  ;;  %v1132_v15 = vmul.f32 %v1131_v5, %v1129_v3  ;;  %v1138_v38 = vld [vmem:[#allocation2 + $0x13] sm:$0xff]  ;;  %v1133_v19 = vmul.f32 %v1131_v5, %v1130_v13 }
 0x205   :  { %v1110_v14 = vadd.f32 %v1108_v57, %v1102_v4  ;;  %v1103_v11 = vadd.f32 %v1101_v60, %v1095_v1  ;;  %v1140_v37 = vmul.f32 %v1139_v10, %v1137_v24  ;;  %v1141_v52 = vmul.f32 %v1139_v10, %v1138_v38 }
 0x207   :  { %v1118_v2 = vadd.f32 %v1116_v17, %v1110_v14  ;;  %v1111_v30 = vadd.f32 %v1109_v26, %v1103_v11 }
 0x209   :  { %v1126_v12 = vadd.f32 %v1124_v9, %v1118_v2  ;;  %v1119_v21 = vadd.f32 %v1117_v36, %v1111_v30 }
 0x20b   :  { %v1134_v18 = vadd.f32 %v1132_v15, %v1126_v12  ;;  %v1127_v46 = vadd.f32 %v1125_v50, %v1119_v21 }
 0x20d   :  { %v1142_v16 = vadd.f32 %v1140_v37, %v1134_v18  ;;  %v1135_v28 = vadd.f32 %v1133_v19, %v1127_v46 }
 0x20f   :  { %v1273_v47 = vmul.f32 -1.442695, %v1142_v16  ;;  %v1143_v23 = vadd.f32 %v1141_v52, %v1135_v28 }
 0x211   :  { %1294 = vpow2.f32 %v1273_v47  ;;  %v1274_v53 = vmul.f32 -1.442695, %v1143_v23 }
 0x213   :  { %1296 = vpow2.f32 %v1274_v53 }
 0x21e   :  { %v1295_v54 = vpop.eup %1294 }
 0x21f   :  { %v1150_v42 = vadd.f32 1.0, %v1295_v54 }
 0x220   :  { %v1297_v35 = vpop.eup %1296 }
 0x221   :  { %1298 = vrcp.f32 %v1150_v42  ;;  %v1151_v40 = vadd.f32 1.0, %v1297_v35 }
 0x223   :  { %1300 = vrcp.f32 %v1151_v40 }
 0x22e   :  { %v1299_v25 = vpop.eup %1298 }
 0x22f   :  { %1156 = vst.msk [vmem:[#allocation8] sm:$0xff] %vm127_vm0, %v1299_v25 }
 0x230   :  { %v1301_v55 = vpop.eup %1300 }
 0x231   :  { %1157 = vst.msk [vmem:[#allocation8 + $0x8] sm:$0xff] %vm127_vm0, %v1301_v55 }
 0x232   :  { %1345 = shalt.err (!%p1342_p0)
}
 0x233   :  { %1169 = dma.vmem_to_hbm [thread:$0]  %s1164_s0, 256, %s2104_s2, [#allocation5], %s1361_s15, %s1361_s15, %s1362_s16  }
 0x234   :  { %1358 = dma.done.wait [#allocation5], 256  }
 0x235   :  { %1359 = vsyncadd [#allocation5], 4294967040 }
 0x236   :  { %1173 = vsyncpa [#allocation4], 1 }
 0x237   :  { %1174 = vsyncpa [#allocation5], 1 }
 0x238   :  { %1175 = vsyncpa [#allocation6], 1 }

</bundles_post_ra>
